<compile_context>
chip_gen: v5e
topology: v5e:2x2
jax: 0.10.0
libtpu: 0.0.40
codegen_flags: <defaults>
</compile_context>

<pallas_src>
import math
import jax
import jax.numpy as jnp
from jax.experimental import pallas as pl
from jax.experimental.pallas import tpu as pltpu

# small, TPU-friendly shapes consistent with the module (d_model scaled down from 512;
# 2 heads keep head_dim = 128 lane-aligned as in the production config 512/4).
B, S, D_MODEL, NUM_HEADS, DFF = 2, 8, 256, 2, 512
D_K = D_MODEL // NUM_HEADS
EPS = 1e-5


def _layer_norm(y, gamma, beta):
    # f32 statistics (y is an f32 accumulator)
    mu = jnp.mean(y, axis=-1, keepdims=True)
    var = jnp.mean((y - mu) ** 2, axis=-1, keepdims=True)
    return (y - mu) * jax.lax.rsqrt(var + EPS) * gamma + beta


def encoder_block_kernel(lens_ref,                      # scalar-prefetch (SMEM)
                         x_ref,
                         wqkv_ref, bqkv_ref, wo_ref, bo_ref,
                         g1_ref, be1_ref,
                         w1_ref, b1_ref, w2_ref, b2_ref,
                         g2_ref, be2_ref,
                         o_ref):
    Sn = x_ref.shape[1]
    Dn = x_ref.shape[2]
    b = pl.program_id(0)

    x = x_ref[0]                                   # (S, D) f32
    x_bf = x.astype(jnp.bfloat16)

    # --- fused Q/K/V projection: one bf16 MXU matmul, f32 accumulation ---
    qkv = jnp.dot(x_bf, wqkv_ref[...], preferred_element_type=jnp.float32) + bqkv_ref[...]

    inv_sqrt_dk = jnp.float32(1.0 / math.sqrt(D_K))
    q = (qkv[:, 0 * Dn:1 * Dn] * inv_sqrt_dk).astype(jnp.bfloat16)   # pre-scale Q once
    k = qkv[:, 1 * Dn:2 * Dn].astype(jnp.bfloat16)
    v = qkv[:, 2 * Dn:3 * Dn].astype(jnp.bfloat16)

    # additive key-padding bias built in-kernel from the prefetched length
    # (torch masks before the 1/sqrt(dk) scale; -1e20 is an effective -inf either way)
    kpos = jax.lax.broadcasted_iota(jnp.int32, (Sn, Sn), dimension=1)
    bias = jnp.where(kpos < lens_ref[b], jnp.float32(0.0), jnp.float32(-1e20))  # (S, S) f32

    # --- per-head attention; each head is a lane-aligned 128-wide slice ---
    head_ctx = []
    for h in range(NUM_HEADS):                     # static unroll over heads
        lo = h * D_K
        qh = q[:, lo:lo + D_K]                     # (S, d_k) bf16
        kh = k[:, lo:lo + D_K]
        vh = v[:, lo:lo + D_K]
        # contract the last dims of both operands -> no explicit transpose
        s = jnp.einsum('qd,kd->qk', qh, kh, preferred_element_type=jnp.float32) + bias
        s = s - jnp.max(s, axis=-1, keepdims=True)          # f32 softmax statistics
        p = jnp.exp(s)
        p = p * pl.reciprocal(jnp.sum(p, axis=-1, keepdims=True), approx=True)
        head_ctx.append(jnp.einsum('qk,kd->qd', p.astype(jnp.bfloat16), vh,
                                   preferred_element_type=jnp.float32))

    # one full-K output projection (K = D) instead of per-head K = d_k matmuls
    ctx = jnp.concatenate(head_ctx, axis=-1).astype(jnp.bfloat16)    # (S, D)
    attn = jnp.dot(ctx, wo_ref[...], preferred_element_type=jnp.float32) + bo_ref[...]

    # residual connection 1: x + LayerNorm(attn(x))   (dropout = 0)
    x1 = x + _layer_norm(attn, g1_ref[...], be1_ref[...])

    # feed-forward: Linear -> ReLU -> Linear (bf16 operands, f32 accumulate / elementwise)
    h1 = jnp.dot(x1.astype(jnp.bfloat16), w1_ref[...],
                 preferred_element_type=jnp.float32) + b1_ref[...]
    h1 = jnp.maximum(h1, 0.0)
    ff = jnp.dot(h1.astype(jnp.bfloat16), w2_ref[...],
                 preferred_element_type=jnp.float32) + b2_ref[...]

    # residual connection 2: x1 + LayerNorm(ffn(x1))
    o_ref[0] = (x1 + _layer_norm(ff, g2_ref[...], be2_ref[...])).astype(o_ref.dtype)


def prepare_params(params):
    """One-time parameter prep (outside the step call): fuse QKV and cast weights to bf16."""
    (wq, bq, wk, bk, wv, bv, wo, bo, g1, be1, w1, b1, w2, b2, g2, be2) = params
    w_qkv = jnp.concatenate([wq, wk, wv], axis=1).astype(jnp.bfloat16)   # (D, 3D)
    b_qkv = jnp.concatenate([bq, bk, bv], axis=1)                        # (1, 3D) f32
    return (w_qkv, b_qkv,
            wo.astype(jnp.bfloat16), bo,
            g1, be1,
            w1.astype(jnp.bfloat16), b1,
            w2.astype(jnp.bfloat16), b2,
            g2, be2)


def encoder_block(x, lengths, prepared):
    (w_qkv, b_qkv, wo, bo, g1, be1, w1, b1, w2, b2, g2, be2) = prepared
    Bn, Sn, Dn = x.shape

    # weights/biases: full-array blocks with a constant index_map -> fetched once, resident
    def const_spec(arr):
        return pl.BlockSpec(arr.shape, lambda b, lens: (0, 0))

    grid_spec = pltpu.PrefetchScalarGridSpec(
        num_scalar_prefetch=1,                       # per-batch key lengths -> SMEM
        grid=(Bn,),                                  # parallel over batch (uses v7x's 2nd TC)
        in_specs=[
            pl.BlockSpec((1, Sn, Dn), lambda b, lens: (b, 0, 0)),        # x: one batch/step
            const_spec(w_qkv), const_spec(b_qkv),
            const_spec(wo), const_spec(bo),
            const_spec(g1), const_spec(be1),
            const_spec(w1), const_spec(b1),
            const_spec(w2), const_spec(b2),
            const_spec(g2), const_spec(be2),
        ],
        out_specs=pl.BlockSpec((1, Sn, Dn), lambda b, lens: (b, 0, 0)),
    )

    return pl.pallas_call(
        encoder_block_kernel,
        out_shape=jax.ShapeDtypeStruct(x.shape, x.dtype),
        grid_spec=grid_spec,
        compiler_params=pltpu.CompilerParams(
            dimension_semantics=("parallel",),
            # TODO(synk): re-derive per generation at production shapes (<=56 MiB on v7x).
            vmem_limit_bytes=64 * 1024 * 1024,
        ),
    )(lengths, x, w_qkv, b_qkv, wo, bo, g1, be1, w1, b1, w2, b2, g2, be2)


def reference(x, lengths, params, matmul_dtype=jnp.float32):
    """Pure-JAX mirror of the PyTorch forward (dropout = 0).
    matmul_dtype=bfloat16 reproduces the kernel's mixed-precision matmuls for a tight
    structural check; float32 is the exact module math."""
    (wq, bq, wk, bk, wv, bv, wo, bo, g1, be1, w1, b1, w2, b2, g2, be2) = params

    def mm(a, w):
        return jnp.dot(a.astype(matmul_dtype), w.astype(matmul_dtype),
                       preferred_element_type=jnp.float32)

    def ln(y, g, be):
        mu = y.mean(-1, keepdims=True)
        var = ((y - mu) ** 2).mean(-1, keepdims=True)
        return (y - mu) / jnp.sqrt(var + EPS) * g + be

    Bn, Sn, Dn = x.shape
    mask = (jnp.arange(Sn)[None, None, :] < lengths[:, None, None])     # (B, 1, S)
    mask = jnp.broadcast_to(mask, (Bn, Sn, Sn))                         # (B, S, S)

    q = (mm(x, wq) + bq).reshape(Bn, Sn, NUM_HEADS, D_K)
    k = (mm(x, wk) + bk).reshape(Bn, Sn, NUM_HEADS, D_K)
    v = (mm(x, wv) + bv).reshape(Bn, Sn, NUM_HEADS, D_K)
    scores = jnp.einsum('nqhd,nkhd->nhqk',
                        q.astype(matmul_dtype), k.astype(matmul_dtype),
                        preferred_element_type=jnp.float32)
    scores = jnp.where(mask[:, None, :, :] == 0, jnp.float32(-1e20), scores)
    attn = jax.nn.softmax(scores / math.sqrt(D_K), axis=3)
    out = jnp.einsum('nhql,nlhd->nqhd',
                     attn.astype(matmul_dtype), v.astype(matmul_dtype),
                     preferred_element_type=jnp.float32).reshape(Bn, Sn, Dn)
    out = mm(out, wo) + bo
    x1 = x + ln(out, g1, be1)
    h1 = jnp.maximum(mm(x1, w1) + b1, 0.0)
    ff = mm(h1, w2) + b2
    return x1 + ln(ff, g2, be2)


if __name__ == "__main__":
    key = jax.random.PRNGKey(0)
    keys = jax.random.split(key, 10)

    x = jax.random.normal(keys[0], (B, S, D_MODEL), dtype=jnp.float32)

    # padding mask: batch 0 attends to all 8 keys, batch 1 only to the first 6
    lengths = jnp.array([S, S - 2], dtype=jnp.int32)

    scale = 0.05
    params = [
        jax.random.normal(keys[1], (D_MODEL, D_MODEL), jnp.float32) * scale,  # W_q
        jax.random.normal(keys[2], (1, D_MODEL), jnp.float32) * scale,        # b_q
        jax.random.normal(keys[3], (D_MODEL, D_MODEL), jnp.float32) * scale,  # W_k
        jax.random.normal(keys[4], (1, D_MODEL), jnp.float32) * scale,        # b_k
        jax.random.normal(keys[5], (D_MODEL, D_MODEL), jnp.float32) * scale,  # W_v
        jax.random.normal(keys[6], (1, D_MODEL), jnp.float32) * scale,        # b_v
        jax.random.normal(keys[7], (D_MODEL, D_MODEL), jnp.float32) * scale,  # W_o
        jax.random.normal(keys[8], (1, D_MODEL), jnp.float32) * scale,        # b_o
        jnp.ones((1, D_MODEL), jnp.float32),                                  # LN1 gamma
        jnp.zeros((1, D_MODEL), jnp.float32),                                 # LN1 beta
        jax.random.normal(keys[9], (D_MODEL, DFF), jnp.float32) * scale,      # FFN W1
        jnp.zeros((1, DFF), jnp.float32),                                     # FFN b1
        jax.random.normal(keys[0], (DFF, D_MODEL), jnp.float32) * scale,      # FFN W2
        jnp.zeros((1, D_MODEL), jnp.float32),                                 # FFN b2
        jnp.ones((1, D_MODEL), jnp.float32),                                  # LN2 gamma
        jnp.zeros((1, D_MODEL), jnp.float32),                                 # LN2 beta
    ]

    prepared = prepare_params(params)   # fused QKV + bf16 weights, done once (not per step)

    out = jax.block_until_ready(encoder_block(x, lengths, prepared))
    assert out.shape == (B, S, D_MODEL)

    # structural check against a matched mixed-precision (bf16-matmul) reference
    ref_bf16 = reference(x, lengths, params, matmul_dtype=jnp.bfloat16)
    assert jnp.allclose(out, ref_bf16, rtol=2e-2, atol=2e-2), \
        "mismatch vs bf16-matched reference"

    # sanity check against the exact f32 module math (bf16-level tolerance)
    ref_f32 = reference(x, lengths, params, matmul_dtype=jnp.float32)
    assert jnp.allclose(out, ref_f32, rtol=1e-1, atol=1e-1), \
        "mismatch vs f32 module reference"

    print("KERNEL_OK")
</pallas_src>

<mosaic_0001>
module attributes {stable_mosaic.version = 11 : i64} {
  func.func @encoder_block_kernel(%arg0: i32, %arg1: memref<2xi32, #tpu.memory_space<smem>>, %arg2: memref<1x8x256xf32, #tpu.memory_space<vmem>>, %arg3: memref<256x768xbf16, #tpu.memory_space<vmem>>, %arg4: memref<1x768xf32, #tpu.memory_space<vmem>>, %arg5: memref<256x256xbf16, #tpu.memory_space<vmem>>, %arg6: memref<1x256xf32, #tpu.memory_space<vmem>>, %arg7: memref<1x256xf32, #tpu.memory_space<vmem>>, %arg8: memref<1x256xf32, #tpu.memory_space<vmem>>, %arg9: memref<256x512xbf16, #tpu.memory_space<vmem>>, %arg10: memref<1x512xf32, #tpu.memory_space<vmem>>, %arg11: memref<512x256xbf16, #tpu.memory_space<vmem>>, %arg12: memref<1x256xf32, #tpu.memory_space<vmem>>, %arg13: memref<1x256xf32, #tpu.memory_space<vmem>>, %arg14: memref<1x256xf32, #tpu.memory_space<vmem>>, %arg15: memref<1x8x256xf32, #tpu.memory_space<vmem>>) attributes {dimension_semantics = [#tpu.dimension_semantics<parallel>], iteration_bounds = array<i64: 2>, scalar_prefetch = 1 : i64, scratch_operands = 0 : i64, tpu.core_type = #tpu.core_type<tc>, window_params = [{transform_indices = @transform_0, window_bounds = array<i64: 1, 8, 256>}, {pipeline_mode = #tpu.pipeline_mode<synchronous>, transform_indices = @transform_1, window_bounds = array<i64: 256, 768>}, {pipeline_mode = #tpu.pipeline_mode<synchronous>, transform_indices = @transform_2, window_bounds = array<i64: 1, 768>}, {pipeline_mode = #tpu.pipeline_mode<synchronous>, transform_indices = @transform_3, window_bounds = array<i64: 256, 256>}, {pipeline_mode = #tpu.pipeline_mode<synchronous>, transform_indices = @transform_4, window_bounds = array<i64: 1, 256>}, {pipeline_mode = #tpu.pipeline_mode<synchronous>, transform_indices = @transform_5, window_bounds = array<i64: 1, 256>}, {pipeline_mode = #tpu.pipeline_mode<synchronous>, transform_indices = @transform_6, window_bounds = array<i64: 1, 256>}, {pipeline_mode = #tpu.pipeline_mode<synchronous>, transform_indices = @transform_7, window_bounds = array<i64: 256, 512>}, {pipeline_mode = #tpu.pipeline_mode<synchronous>, transform_indices = @transform_8, window_bounds = array<i64: 1, 512>}, {pipeline_mode = #tpu.pipeline_mode<synchronous>, transform_indices = @transform_9, window_bounds = array<i64: 512, 256>}, {pipeline_mode = #tpu.pipeline_mode<synchronous>, transform_indices = @transform_10, window_bounds = array<i64: 1, 256>}, {pipeline_mode = #tpu.pipeline_mode<synchronous>, transform_indices = @transform_11, window_bounds = array<i64: 1, 256>}, {pipeline_mode = #tpu.pipeline_mode<synchronous>, transform_indices = @transform_12, window_bounds = array<i64: 1, 256>}, {transform_indices = @transform_13, window_bounds = array<i64: 1, 8, 256>}]} {
    %c0 = arith.constant 0 : index
    %c0_0 = arith.constant 0 : index
    %c0_1 = arith.constant 0 : index
    %0 = vector.load %arg2[%c0, %c0_0, %c0_1] : memref<1x8x256xf32, #tpu.memory_space<vmem>>, vector<1x8x256xf32>
    %1 = vector.shape_cast %0 : vector<1x8x256xf32> to vector<8x256xf32>
    %2 = arith.truncf %1 : vector<8x256xf32> to vector<8x256xbf16>
    %c0_2 = arith.constant 0 : index
    %c0_3 = arith.constant 0 : index
    %3 = vector.load %arg3[%c0_2, %c0_3] : memref<256x768xbf16, #tpu.memory_space<vmem>>, vector<256x768xbf16>
    %cst = arith.constant dense<0.000000e+00> : vector<8x768xf32>
    %4 = tpu.matmul %2, %3, %cst {dimension_numbers = #tpu.dot_dimension_numbers<[1], [0], [0], [1], [0, 0, 1, 1], [], []>} : vector<8x256xbf16>, vector<256x768xbf16>, vector<8x768xf32> -> vector<8x768xf32>
    %c0_4 = arith.constant 0 : index
    %c0_5 = arith.constant 0 : index
    %5 = vector.load %arg4[%c0_4, %c0_5] : memref<1x768xf32, #tpu.memory_space<vmem>>, vector<1x768xf32>
    %6 = vector.broadcast %5 : vector<1x768xf32> to vector<8x768xf32>
    %7 = arith.addf %4, %6 : vector<8x768xf32>
    %8 = vector.extract_strided_slice %7 {offsets = [0, 0], sizes = [8, 256], strides = [1, 1]} : vector<8x768xf32> to vector<8x256xf32>
    %cst_6 = arith.constant 0.0883883461 : f32
    %9 = vector.broadcast %cst_6 : f32 to vector<8x256xf32>
    %10 = arith.mulf %8, %9 : vector<8x256xf32>
    %11 = arith.truncf %10 : vector<8x256xf32> to vector<8x256xbf16>
    %12 = vector.extract_strided_slice %7 {offsets = [0, 256], sizes = [8, 256], strides = [1, 1]} : vector<8x768xf32> to vector<8x256xf32>
    %13 = arith.truncf %12 : vector<8x256xf32> to vector<8x256xbf16>
    %14 = vector.extract_strided_slice %7 {offsets = [0, 512], sizes = [8, 256], strides = [1, 1]} : vector<8x768xf32> to vector<8x256xf32>
    %15 = arith.truncf %14 : vector<8x256xf32> to vector<8x256xbf16>
    %16 = tpu.iota {dimensions = array<i32: 1>} : vector<8x8xi32>
    %17 = arith.index_cast %arg0 : i32 to index
    %18 = memref.load %arg1[%17] : memref<2xi32, #tpu.memory_space<smem>>
    %19 = vector.broadcast %18 : i32 to vector<8x8xi32>
    %20 = arith.cmpi slt, %16, %19 : vector<8x8xi32>
    %cst_7 = arith.constant 0.000000e+00 : f32
    %cst_8 = arith.constant -1.000000e+20 : f32
    %21 = vector.broadcast %cst_7 : f32 to vector<8x8xf32>
    %22 = vector.broadcast %cst_8 : f32 to vector<8x8xf32>
    %23 = arith.select %20, %21, %22 : vector<8x8xi1>, vector<8x8xf32>
    %24 = vector.extract_strided_slice %11 {offsets = [0, 0], sizes = [8, 128], strides = [1, 1]} : vector<8x256xbf16> to vector<8x128xbf16>
    %25 = vector.extract_strided_slice %13 {offsets = [0, 0], sizes = [8, 128], strides = [1, 1]} : vector<8x256xbf16> to vector<8x128xbf16>
    %26 = vector.extract_strided_slice %15 {offsets = [0, 0], sizes = [8, 128], strides = [1, 1]} : vector<8x256xbf16> to vector<8x128xbf16>
    "tpu.trace_start"() <{level = 10 : i32, message = "qd,kd->qk"}> : () -> ()
    %cst_9 = arith.constant dense<0.000000e+00> : vector<8x8xf32>
    %27 = tpu.matmul %24, %25, %cst_9 {dimension_numbers = #tpu.dot_dimension_numbers<[1], [1], [0], [0], [0, 0, 1, 0], [], []>} : vector<8x128xbf16>, vector<8x128xbf16>, vector<8x8xf32> -> vector<8x8xf32>
    "tpu.trace_stop"() : () -> ()
    %28 = arith.addf %27, %23 : vector<8x8xf32>
    %cst_10 = arith.constant dense<0xFF800000> : vector<8xf32>
    %29 = vector.multi_reduction <maximumf>, %28, %cst_10 [1] : vector<8x8xf32> to vector<8xf32>
    %30 = vector.shape_cast %29 : vector<8xf32> to vector<8x1xf32>
    %31 = vector.broadcast %30 : vector<8x1xf32> to vector<8x8xf32>
    %32 = arith.subf %28, %31 : vector<8x8xf32>
    %33 = math.exp %32 : vector<8x8xf32>
    %cst_11 = arith.constant dense<0.000000e+00> : vector<8xf32>
    %34 = vector.multi_reduction <add>, %33, %cst_11 [1] : vector<8x8xf32> to vector<8xf32>
    %35 = vector.shape_cast %34 : vector<8xf32> to vector<8x1xf32>
    %36 = tpu.reciprocal %35 {approx = true} : vector<8x1xf32> -> vector<8x1xf32>
    %37 = vector.broadcast %36 : vector<8x1xf32> to vector<8x8xf32>
    %38 = arith.mulf %33, %37 : vector<8x8xf32>
    %39 = arith.truncf %38 : vector<8x8xf32> to vector<8x8xbf16>
    "tpu.trace_start"() <{level = 10 : i32, message = "qk,kd->qd"}> : () -> ()
    %cst_12 = arith.constant dense<0.000000e+00> : vector<8x128xf32>
    %40 = tpu.matmul %39, %26, %cst_12 {dimension_numbers = #tpu.dot_dimension_numbers<[1], [0], [0], [1], [0, 0, 1, 1], [], []>} : vector<8x8xbf16>, vector<8x128xbf16>, vector<8x128xf32> -> vector<8x128xf32>
    "tpu.trace_stop"() : () -> ()
    %41 = vector.extract_strided_slice %11 {offsets = [0, 128], sizes = [8, 128], strides = [1, 1]} : vector<8x256xbf16> to vector<8x128xbf16>
    %42 = vector.extract_strided_slice %13 {offsets = [0, 128], sizes = [8, 128], strides = [1, 1]} : vector<8x256xbf16> to vector<8x128xbf16>
    %43 = vector.extract_strided_slice %15 {offsets = [0, 128], sizes = [8, 128], strides = [1, 1]} : vector<8x256xbf16> to vector<8x128xbf16>
    "tpu.trace_start"() <{level = 10 : i32, message = "qd,kd->qk"}> : () -> ()
    %cst_13 = arith.constant dense<0.000000e+00> : vector<8x8xf32>
    %44 = tpu.matmul %41, %42, %cst_13 {dimension_numbers = #tpu.dot_dimension_numbers<[1], [1], [0], [0], [0, 0, 1, 0], [], []>} : vector<8x128xbf16>, vector<8x128xbf16>, vector<8x8xf32> -> vector<8x8xf32>
    "tpu.trace_stop"() : () -> ()
    %45 = arith.addf %44, %23 : vector<8x8xf32>
    %cst_14 = arith.constant dense<0xFF800000> : vector<8xf32>
    %46 = vector.multi_reduction <maximumf>, %45, %cst_14 [1] : vector<8x8xf32> to vector<8xf32>
    %47 = vector.shape_cast %46 : vector<8xf32> to vector<8x1xf32>
    %48 = vector.broadcast %47 : vector<8x1xf32> to vector<8x8xf32>
    %49 = arith.subf %45, %48 : vector<8x8xf32>
    %50 = math.exp %49 : vector<8x8xf32>
    %cst_15 = arith.constant dense<0.000000e+00> : vector<8xf32>
    %51 = vector.multi_reduction <add>, %50, %cst_15 [1] : vector<8x8xf32> to vector<8xf32>
    %52 = vector.shape_cast %51 : vector<8xf32> to vector<8x1xf32>
    %53 = tpu.reciprocal %52 {approx = true} : vector<8x1xf32> -> vector<8x1xf32>
    %54 = vector.broadcast %53 : vector<8x1xf32> to vector<8x8xf32>
    %55 = arith.mulf %50, %54 : vector<8x8xf32>
    %56 = arith.truncf %55 : vector<8x8xf32> to vector<8x8xbf16>
    "tpu.trace_start"() <{level = 10 : i32, message = "qk,kd->qd"}> : () -> ()
    %cst_16 = arith.constant dense<0.000000e+00> : vector<8x128xf32>
    %57 = tpu.matmul %56, %43, %cst_16 {dimension_numbers = #tpu.dot_dimension_numbers<[1], [0], [0], [1], [0, 0, 1, 1], [], []>} : vector<8x8xbf16>, vector<8x128xbf16>, vector<8x128xf32> -> vector<8x128xf32>
    "tpu.trace_stop"() : () -> ()
    %58 = tpu.concatenate %40, %57 in 1 : vector<8x128xf32>, vector<8x128xf32> -> vector<8x256xf32>
    %59 = arith.truncf %58 : vector<8x256xf32> to vector<8x256xbf16>
    %c0_17 = arith.constant 0 : index
    %c0_18 = arith.constant 0 : index
    %60 = vector.load %arg5[%c0_17, %c0_18] : memref<256x256xbf16, #tpu.memory_space<vmem>>, vector<256x256xbf16>
    %cst_19 = arith.constant dense<0.000000e+00> : vector<8x256xf32>
    %61 = tpu.matmul %59, %60, %cst_19 {dimension_numbers = #tpu.dot_dimension_numbers<[1], [0], [0], [1], [0, 0, 1, 1], [], []>} : vector<8x256xbf16>, vector<256x256xbf16>, vector<8x256xf32> -> vector<8x256xf32>
    %c0_20 = arith.constant 0 : index
    %c0_21 = arith.constant 0 : index
    %62 = vector.load %arg6[%c0_20, %c0_21] : memref<1x256xf32, #tpu.memory_space<vmem>>, vector<1x256xf32>
    %63 = vector.broadcast %62 : vector<1x256xf32> to vector<8x256xf32>
    %64 = arith.addf %61, %63 : vector<8x256xf32>
    %c0_22 = arith.constant 0 : index
    %c0_23 = arith.constant 0 : index
    %65 = vector.load %arg7[%c0_22, %c0_23] : memref<1x256xf32, #tpu.memory_space<vmem>>, vector<1x256xf32>
    %c0_24 = arith.constant 0 : index
    %c0_25 = arith.constant 0 : index
    %66 = vector.load %arg8[%c0_24, %c0_25] : memref<1x256xf32, #tpu.memory_space<vmem>>, vector<1x256xf32>
    %cst_26 = arith.constant dense<0.000000e+00> : vector<8xf32>
    %67 = vector.multi_reduction <add>, %64, %cst_26 [1] : vector<8x256xf32> to vector<8xf32>
    %68 = vector.shape_cast %67 : vector<8xf32> to vector<8x1xf32>
    %cst_27 = arith.constant 2.560000e+02 : f32
    %69 = vector.broadcast %cst_27 : f32 to vector<8x1xf32>
    %70 = arith.divf %68, %69 : vector<8x1xf32>
    %71 = vector.broadcast %70 : vector<8x1xf32> to vector<8x256xf32>
    %72 = arith.subf %64, %71 : vector<8x256xf32>
    %73 = arith.mulf %72, %72 : vector<8x256xf32>
    %cst_28 = arith.constant dense<0.000000e+00> : vector<8xf32>
    %74 = vector.multi_reduction <add>, %73, %cst_28 [1] : vector<8x256xf32> to vector<8xf32>
    %75 = vector.shape_cast %74 : vector<8xf32> to vector<8x1xf32>
    %cst_29 = arith.constant 2.560000e+02 : f32
    %76 = vector.broadcast %cst_29 : f32 to vector<8x1xf32>
    %77 = arith.divf %75, %76 : vector<8x1xf32>
    %78 = vector.broadcast %70 : vector<8x1xf32> to vector<8x256xf32>
    %79 = arith.subf %64, %78 : vector<8x256xf32>
    %cst_30 = arith.constant 9.99999974E-6 : f32
    %80 = vector.broadcast %cst_30 : f32 to vector<8x1xf32>
    %81 = arith.addf %77, %80 : vector<8x1xf32>
    %82 = math.rsqrt %81 : vector<8x1xf32>
    %83 = vector.broadcast %82 : vector<8x1xf32> to vector<8x256xf32>
    %84 = arith.mulf %79, %83 : vector<8x256xf32>
    %85 = vector.broadcast %65 : vector<1x256xf32> to vector<8x256xf32>
    %86 = arith.mulf %84, %85 : vector<8x256xf32>
    %87 = vector.broadcast %66 : vector<1x256xf32> to vector<8x256xf32>
    %88 = arith.addf %86, %87 : vector<8x256xf32>
    %89 = arith.addf %1, %88 : vector<8x256xf32>
    %90 = arith.truncf %89 : vector<8x256xf32> to vector<8x256xbf16>
    %c0_31 = arith.constant 0 : index
    %c0_32 = arith.constant 0 : index
    %91 = vector.load %arg9[%c0_31, %c0_32] : memref<256x512xbf16, #tpu.memory_space<vmem>>, vector<256x512xbf16>
    %cst_33 = arith.constant dense<0.000000e+00> : vector<8x512xf32>
    %92 = tpu.matmul %90, %91, %cst_33 {dimension_numbers = #tpu.dot_dimension_numbers<[1], [0], [0], [1], [0, 0, 1, 1], [], []>} : vector<8x256xbf16>, vector<256x512xbf16>, vector<8x512xf32> -> vector<8x512xf32>
    %c0_34 = arith.constant 0 : index
    %c0_35 = arith.constant 0 : index
    %93 = vector.load %arg10[%c0_34, %c0_35] : memref<1x512xf32, #tpu.memory_space<vmem>>, vector<1x512xf32>
    %94 = vector.broadcast %93 : vector<1x512xf32> to vector<8x512xf32>
    %95 = arith.addf %92, %94 : vector<8x512xf32>
    %cst_36 = arith.constant 0.000000e+00 : f32
    %96 = vector.broadcast %cst_36 : f32 to vector<8x512xf32>
    %97 = arith.maximumf %95, %96 : vector<8x512xf32>
    %98 = arith.truncf %97 : vector<8x512xf32> to vector<8x512xbf16>
    %c0_37 = arith.constant 0 : index
    %c0_38 = arith.constant 0 : index
    %99 = vector.load %arg11[%c0_37, %c0_38] : memref<512x256xbf16, #tpu.memory_space<vmem>>, vector<512x256xbf16>
    %cst_39 = arith.constant dense<0.000000e+00> : vector<8x256xf32>
    %100 = tpu.matmul %98, %99, %cst_39 {dimension_numbers = #tpu.dot_dimension_numbers<[1], [0], [0], [1], [0, 0, 1, 1], [], []>} : vector<8x512xbf16>, vector<512x256xbf16>, vector<8x256xf32> -> vector<8x256xf32>
    %c0_40 = arith.constant 0 : index
    %c0_41 = arith.constant 0 : index
    %101 = vector.load %arg12[%c0_40, %c0_41] : memref<1x256xf32, #tpu.memory_space<vmem>>, vector<1x256xf32>
    %102 = vector.broadcast %101 : vector<1x256xf32> to vector<8x256xf32>
    %103 = arith.addf %100, %102 : vector<8x256xf32>
    %c0_42 = arith.constant 0 : index
    %c0_43 = arith.constant 0 : index
    %104 = vector.load %arg13[%c0_42, %c0_43] : memref<1x256xf32, #tpu.memory_space<vmem>>, vector<1x256xf32>
    %c0_44 = arith.constant 0 : index
    %c0_45 = arith.constant 0 : index
    %105 = vector.load %arg14[%c0_44, %c0_45] : memref<1x256xf32, #tpu.memory_space<vmem>>, vector<1x256xf32>
    %cst_46 = arith.constant dense<0.000000e+00> : vector<8xf32>
    %106 = vector.multi_reduction <add>, %103, %cst_46 [1] : vector<8x256xf32> to vector<8xf32>
    %107 = vector.shape_cast %106 : vector<8xf32> to vector<8x1xf32>
    %cst_47 = arith.constant 2.560000e+02 : f32
    %108 = vector.broadcast %cst_47 : f32 to vector<8x1xf32>
    %109 = arith.divf %107, %108 : vector<8x1xf32>
    %110 = vector.broadcast %109 : vector<8x1xf32> to vector<8x256xf32>
    %111 = arith.subf %103, %110 : vector<8x256xf32>
    %112 = arith.mulf %111, %111 : vector<8x256xf32>
    %cst_48 = arith.constant dense<0.000000e+00> : vector<8xf32>
    %113 = vector.multi_reduction <add>, %112, %cst_48 [1] : vector<8x256xf32> to vector<8xf32>
    %114 = vector.shape_cast %113 : vector<8xf32> to vector<8x1xf32>
    %cst_49 = arith.constant 2.560000e+02 : f32
    %115 = vector.broadcast %cst_49 : f32 to vector<8x1xf32>
    %116 = arith.divf %114, %115 : vector<8x1xf32>
    %117 = vector.broadcast %109 : vector<8x1xf32> to vector<8x256xf32>
    %118 = arith.subf %103, %117 : vector<8x256xf32>
    %cst_50 = arith.constant 9.99999974E-6 : f32
    %119 = vector.broadcast %cst_50 : f32 to vector<8x1xf32>
    %120 = arith.addf %116, %119 : vector<8x1xf32>
    %121 = math.rsqrt %120 : vector<8x1xf32>
    %122 = vector.broadcast %121 : vector<8x1xf32> to vector<8x256xf32>
    %123 = arith.mulf %118, %122 : vector<8x256xf32>
    %124 = vector.broadcast %104 : vector<1x256xf32> to vector<8x256xf32>
    %125 = arith.mulf %123, %124 : vector<8x256xf32>
    %126 = vector.broadcast %105 : vector<1x256xf32> to vector<8x256xf32>
    %127 = arith.addf %125, %126 : vector<8x256xf32>
    %128 = arith.addf %89, %127 : vector<8x256xf32>
    %c0_51 = arith.constant 0 : index
    %c0_52 = arith.constant 0 : index
    %c0_53 = arith.constant 0 : index
    %129 = vector.load %arg15[%c0_51, %c0_52, %c0_53] : memref<1x8x256xf32, #tpu.memory_space<vmem>>, vector<1x8x256xf32>
    %130 = vector.shape_cast %129 : vector<1x8x256xf32> to vector<8x256xf32>
    %131 = vector.shape_cast %128 : vector<8x256xf32> to vector<1x8x256xf32>
    tpu.vector_store %arg15[%c0_51, %c0_52, %c0_53], %131 {strides = array<i32>} : memref<1x8x256xf32, #tpu.memory_space<vmem>>, vector<1x8x256xf32>,
    return
  }
  func.func @transform_0(%arg0: i32, %arg1: memref<2xi32, #tpu.memory_space<smem>>) -> (i32, i32, i32) {
    %c0_i32 = arith.constant 0 : i32
    %c0_i32_0 = arith.constant 0 : i32
    %c0_i32_1 = arith.constant 0 : i32
    return %arg0, %c0_i32, %c0_i32_0 : i32, i32, i32
  }
  func.func @transform_1(%arg0: i32, %arg1: memref<2xi32, #tpu.memory_space<smem>>) -> (i32, i32) {
    %c0_i32 = arith.constant 0 : i32
    %c0_i32_0 = arith.constant 0 : i32
    %c0_i32_1 = arith.constant 0 : i32
    return %c0_i32, %c0_i32_0 : i32, i32
  }
  func.func @transform_2(%arg0: i32, %arg1: memref<2xi32, #tpu.memory_space<smem>>) -> (i32, i32) {
    %c0_i32 = arith.constant 0 : i32
    %c0_i32_0 = arith.constant 0 : i32
    %c0_i32_1 = arith.constant 0 : i32
    return %c0_i32, %c0_i32_0 : i32, i32
  }
  func.func @transform_3(%arg0: i32, %arg1: memref<2xi32, #tpu.memory_space<smem>>) -> (i32, i32) {
    %c0_i32 = arith.constant 0 : i32
    %c0_i32_0 = arith.constant 0 : i32
    %c0_i32_1 = arith.constant 0 : i32
    return %c0_i32, %c0_i32_0 : i32, i32
  }
  func.func @transform_4(%arg0: i32, %arg1: memref<2xi32, #tpu.memory_space<smem>>) -> (i32, i32) {
    %c0_i32 = arith.constant 0 : i32
    %c0_i32_0 = arith.constant 0 : i32
    %c0_i32_1 = arith.constant 0 : i32
    return %c0_i32, %c0_i32_0 : i32, i32
  }
  func.func @transform_5(%arg0: i32, %arg1: memref<2xi32, #tpu.memory_space<smem>>) -> (i32, i32) {
    %c0_i32 = arith.constant 0 : i32
    %c0_i32_0 = arith.constant 0 : i32
    %c0_i32_1 = arith.constant 0 : i32
    return %c0_i32, %c0_i32_0 : i32, i32
  }
  func.func @transform_6(%arg0: i32, %arg1: memref<2xi32, #tpu.memory_space<smem>>) -> (i32, i32) {
    %c0_i32 = arith.constant 0 : i32
    %c0_i32_0 = arith.constant 0 : i32
    %c0_i32_1 = arith.constant 0 : i32
    return %c0_i32, %c0_i32_0 : i32, i32
  }
  func.func @transform_7(%arg0: i32, %arg1: memref<2xi32, #tpu.memory_space<smem>>) -> (i32, i32) {
    %c0_i32 = arith.constant 0 : i32
    %c0_i32_0 = arith.constant 0 : i32
    %c0_i32_1 = arith.constant 0 : i32
    return %c0_i32, %c0_i32_0 : i32, i32
  }
  func.func @transform_8(%arg0: i32, %arg1: memref<2xi32, #tpu.memory_space<smem>>) -> (i32, i32) {
    %c0_i32 = arith.constant 0 : i32
    %c0_i32_0 = arith.constant 0 : i32
    %c0_i32_1 = arith.constant 0 : i32
    return %c0_i32, %c0_i32_0 : i32, i32
  }
  func.func @transform_9(%arg0: i32, %arg1: memref<2xi32, #tpu.memory_space<smem>>) -> (i32, i32) {
    %c0_i32 = arith.constant 0 : i32
    %c0_i32_0 = arith.constant 0 : i32
    %c0_i32_1 = arith.constant 0 : i32
    return %c0_i32, %c0_i32_0 : i32, i32
  }
  func.func @transform_10(%arg0: i32, %arg1: memref<2xi32, #tpu.memory_space<smem>>) -> (i32, i32) {
    %c0_i32 = arith.constant 0 : i32
    %c0_i32_0 = arith.constant 0 : i32
    %c0_i32_1 = arith.constant 0 : i32
    return %c0_i32, %c0_i32_0 : i32, i32
  }
  func.func @transform_11(%arg0: i32, %arg1: memref<2xi32, #tpu.memory_space<smem>>) -> (i32, i32) {
    %c0_i32 = arith.constant 0 : i32
    %c0_i32_0 = arith.constant 0 : i32
    %c0_i32_1 = arith.constant 0 : i32
    return %c0_i32, %c0_i32_0 : i32, i32
  }
  func.func @transform_12(%arg0: i32, %arg1: memref<2xi32, #tpu.memory_space<smem>>) -> (i32, i32) {
    %c0_i32 = arith.constant 0 : i32
    %c0_i32_0 = arith.constant 0 : i32
    %c0_i32_1 = arith.constant 0 : i32
    return %c0_i32, %c0_i32_0 : i32, i32
  }
  func.func @transform_13(%arg0: i32, %arg1: memref<2xi32, #tpu.memory_space<smem>>) -> (i32, i32, i32) {
    %c0_i32 = arith.constant 0 : i32
    %c0_i32_0 = arith.constant 0 : i32
    %c0_i32_1 = arith.constant 0 : i32
    return %arg0, %c0_i32, %c0_i32_0 : i32, i32, i32
  }
}

</mosaic_0001>

<bundles_post_ra>
// kernel: tpu_custom_call.1
= control target key start
LH: loop header
LB: loop body
LE: loop exit
PB: predicated region body
PF: predicated region fallthrough
CT: control target
= control target key end

     0   :  { %s4736_s16 = smov [#allocation3]   ;;  %s5133_s0 = inlined_call_operand.hbm [shape: s32[2], index: 0, kind: input, shape index: {}]   ;;  %s5134_s1 = inlined_call_operand.hbm [shape: f32[2,8,256], index: 1, kind: input, shape index: {}]   ;;  %s5135_s2 = inlined_call_operand.hbm [shape: bf16[256,768], index: 2, kind: input, shape index: {}]   ;;  %s5136_s3 = inlined_call_operand.hbm [shape: f32[1,768], index: 3, kind: input, shape index: {}]   ;;  %s5137_s4 = inlined_call_operand.hbm [shape: bf16[256,256], index: 4, kind: input, shape index: {}]   ;;  %s5138_s5 = inlined_call_operand.vmem [shape: f32[1,256], index: 5, kind: input, shape index: {}]   ;;  %s5139_s6 = inlined_call_operand.hbm [shape: f32[1,256], index: 6, kind: input, shape index: {}]   ;;  %s5140_s7 = inlined_call_operand.hbm [shape: f32[1,256], index: 7, kind: input, shape index: {}]   ;;  %s5141_s8 = inlined_call_operand.hbm [shape: bf16[256,512], index: 8, kind: input, shape index: {}]   ;;  %s5142_s9 = inlined_call_operand.vmem [shape: f32[1,512], index: 9, kind: input, shape index: {}]   ;;  %s5143_s10 = inlined_call_operand.hbm [shape: bf16[512,256], index: 10, kind: input, shape index: {}]   ;;  %s5144_s11 = inlined_call_operand.vmem [shape: f32[1,256], index: 11, kind: input, shape index: {}]   ;;  %s5145_s12 = inlined_call_operand.vmem [shape: f32[1,256], index: 12, kind: input, shape index: {}]   ;;  %s5146_s13 = inlined_call_operand.vmem [shape: f32[1,256], index: 13, kind: input, shape index: {}]   ;;  %s5147_s14 = inlined_call_operand.hbm [shape: f32[2,8,256], index: 14, kind: output, shape index: {}]  }
   0x1   :  { %5149 = sst [smem:[#allocation26_spill]] %s5135_s2  ;;  %s20_s15 = sshll.u32 %s5133_s0, 4  ;;  %s21_s15 = int_to_ptr.hbm [resolvable:$true] %s20_s15 }
   0x2   :  { %5150 = sst [smem:[#allocation27_spill]] %s5136_s3 }
   0x3   :  { %5151 = sst [smem:[#allocation28_spill]] %s5137_s4 }
   0x4   :  { %5152 = sst [smem:[#allocation29_spill]] %s5139_s6 }
   0x5   :  { %5153 = sst [smem:[#allocation30_spill]] %s5145_s12 }
   0x6   :  { %5154 = sst [smem:[#allocation31_spill]] %s5146_s13 }
   0x7   :  { %5155 = sst [smem:[#allocation32_spill]] %s5147_s14 }
   0x8   :  { %23 = dma.hbm_to_smem %s21_s15, 16, %s4736_s16, [#allocation2] }
   0x9   :  { %4694 = dma.done.wait [#allocation2], 16 }
   0xa   :  { %4695 = vsyncadd [#allocation2], 4294967280 }
   0xb   :  { %26 = sfence }
   0xc   :  { %27 = vsyncpa [#allocation5], 0 }
   0xd   :  { %29 = vsyncpa [#allocation5 + $0x1], 0 }
   0xe   :  { %30 = vsyncpa [#allocation8], 0 }
   0xf   :  { %31 = vsyncpa [#allocation11], 0 }
  0x10   :  { %32 = vsyncpa [#allocation14], 0 }
  0x11   :  { %33 = vsyncpa [#allocation17], 0 }
  0x12   :  { %34 = vsyncpa [#allocation6], 0 }
  0x13   :  { %36 = vsyncpa [#allocation6 + $0x1], 0  ;;  %s4830_s17 = smov 0   ;;  %s4832_s18 = smov 0  }
  0x14   :  { %s4834_s19 = smov 0   ;;  %s4836_s0 = smov 0  }
  0x15 LB: > { %s5156_s2 = sld [smem:[#allocation26_spill]]  ;;  %s4854_s23 = sadd.s32 4294967295, %s4734_s0   ;;  %s4734_s0 = sphi %s4836_s0, %s5173_s0   ;;  %s4730_s19 = sphi %s4834_s19, %s5172_s19   ;;  %s4726_s18 = sphi %s4832_s18, %s5171_s18   ;;  %s4722_s17 = sphi %s4830_s17, %s5170_s17  }
  0x16   : > { %p2945_p0 = scmp.ge.s32.totalorder %s4734_s0, 1  ;;  %p63_p1 = scmp.eq.s32.totalorder %s4854_s23, 0 }
  0x17   : > { %p351_p2 = scmp.lt.s32.totalorder %s4734_s0, 3  ;;  %s4737_s25 = smov [#allocation7]  }
  0x18   : > { %s364_s26 = sshll.u32 %s4737_s25, 4  ;;  %s5158_s4 = sld [smem:[#allocation28_spill]]  ;;  %s365_s26 = int_to_ptr.vmem [resolvable:$true] %s364_s26 }
  0x19   : > { %p4859_p3 = pnand %p2945_p0, %p351_p2  ;;  %s4738_s15 = smov [#allocation10]  }
  0x1a   : > { %s390_s16 = sshll.u32 %s4738_s15, 4  ;;  %s4739_s20 = smov 384   ;;  %s391_s16 = int_to_ptr.vmem [resolvable:$true] %s390_s16 }
  0x1b   : > { %s362_s22 = sshll.u32 %s5156_s2, 4  ;;  %p4288_p4 = pneg %p4859_p3  ;;  %s363_s22 = int_to_ptr.hbm [resolvable:$true] %s362_s22 }
  0x1c   : > { %s4740_s21 = smov 24   ;;  %s4741_s25 = smov 128  }
  0x1d   : > { %p4871_p6 = pnand %p4288_p4, %p63_p1  ;;  %s4742_s27 = smov 8  }
  0x1e   : > { %s388_s29 = sshll.u32 %s5158_s4, 4  ;;  %s418_s4 = sshll.u32 %s5140_s7, 4  ;;  %s389_s29 = int_to_ptr.hbm [resolvable:$true] %s388_s29  ;;  %s419_s4 = int_to_ptr.hbm [resolvable:$true] %s418_s4 }
  0x1f   : > { %4291 = dma.hbm_to_vmem [thread:$0]  (!%p4871_p6), %s363_s22, 12288, %s365_s26, [#allocation8], %s4739_s20, %s4739_s20, %s4740_s21  }
  0x20   : > { %4297 = dma.hbm_to_vmem [thread:$0]  (!%p4871_p6), %s389_s29, 4096, %s391_s16, [#allocation11], %s4741_s25, %s4741_s25, %s4742_s27  }
  0x21   : > { %s4743_s14 = smov [#allocation13]   ;;  %s5160_s3 = sld [smem:[#allocation27_spill]] }
  0x22   : > { %s420_s15 = sshll.u32 %s4743_s14, 4  ;;  %s4744_s20 = smov [#allocation9]   ;;  %s421_s15 = int_to_ptr.vmem [resolvable:$true] %s420_s15 }
  0x23   : > { %4303 = dma.hbm_to_vmem [thread:$0]  (!%p4871_p6), %s419_s4, 32, %s421_s15, [#allocation14]  }
  0x24   : > { %s379_s21 = sshll.u32 %s4744_s20, 4  ;;  %s5161_s6 = sld [smem:[#allocation29_spill]]  ;;  %s380_s21 = int_to_ptr.vmem [resolvable:$true] %s379_s21 }
  0x25   : > { %s429_s28 = sshll.u32 %s5141_s8, 4  ;;  %s4745_s13 = smov [#allocation12]   ;;  %s430_s28 = int_to_ptr.hbm [resolvable:$true] %s429_s28 }
  0x26   : > { %s408_s22 = sshll.u32 %s4745_s13, 4  ;;  %s4746_s4 = smov [#allocation15]   ;;  %s409_s22 = int_to_ptr.vmem [resolvable:$true] %s408_s22 }
  0x27   : > { %s377_s26 = sshll.u32 %s5160_s3, 4  ;;  %s431_s12 = sshll.u32 %s4746_s4, 4  ;;  %s378_s26 = int_to_ptr.hbm [resolvable:$true] %s377_s26  ;;  %s432_s12 = int_to_ptr.vmem [resolvable:$true] %s431_s12 }
  0x28   : > { %4294 = dma.hbm_to_vmem [thread:$0]  (!%p4871_p6), %s378_s26, 96, %s380_s21, [#allocation8]  }
  0x29   : > { %s4747_s15 = smov 256   ;;  %s4748_s26 = smov 16  }
  0x2a   : > { %s406_s2 = sshll.u32 %s5161_s6, 4  ;;  %s446_s29 = sshll.u32 %s5143_s10, 4  ;;  %s407_s2 = int_to_ptr.hbm [resolvable:$true] %s406_s2  ;;  %s447_s29 = int_to_ptr.hbm [resolvable:$true] %s446_s29 }
  0x2b   : > { %4300 = dma.hbm_to_vmem [thread:$0]  (!%p4871_p6), %s407_s2, 32, %s409_s22, [#allocation11]  }
  0x2c   : > { %4306 = dma.hbm_to_vmem [thread:$0]  (!%p4871_p6), %s430_s28, 8192, %s432_s12, [#allocation14], %s4747_s15, %s4747_s15, %s4748_s26  }
  0x2d   : > { %s4749_s2 = smov [#allocation16]   ;;  %s2944_s16 = sadd.s32 4294967294, %s4734_s0  }
  0x2e   : > { %s448_s14 = sshll.u32 %s4749_s2, 4  ;;  %s4912_s13 = sadd.s32 1, %s4734_s0   ;;  %s449_s14 = int_to_ptr.vmem [resolvable:$true] %s448_s14 }
  0x2f   : > { %4309 = dma.hbm_to_vmem [thread:$0]  (!%p4871_p6), %s447_s29, 8192, %s449_s14, [#allocation17], %s4741_s25, %s4741_s25, %s4742_s27  }
  0x30   : > { %s49_s28 = sadd.s32 1, %s4730_s19  ;;  %s46_s22 = ssub.s32 %s4734_s0, %s4912_s13 }
  0x31   : > { %p56_p7 = scmp.ne.s32.totalorder %s4730_s19, %s4726_s18  ;;  %p47_p8 = scmp.eq.s32.totalorder %s46_s22, 0 }
  0x32   : > { %p57_p9 = scmp.eq.s32.totalorder %s4734_s0, 0  ;;  %p62_p10 = scmp.ne.s32.totalorder %s4726_s18, %s4722_s17 }
  0x33   : > { %p338_p11 = scmp.eq.s32.totalorder %s4854_s23, 1  ;;  %p344_p0 = scmp.eq.s32.totalorder %s2944_s16, 1 }
  0x34   : > { %s4924_s4 = scalar_select %p47_p8, %s4730_s19, %s49_s28  }
  0x35   : > { %p4928_p12 = por %p63_p1, %p62_p10  ;;  %p4932_p13 = por %p338_p11, %p56_p7 }
  0x36   : > { %p58_p2 = por %p57_p9, %p56_p7  ;;  %s471_s27 = sand.u32 1, %s4730_s19  }
  0x37   : > { %p4937_p4 = por %p344_p0, %p62_p10  ;;  %p4325_p6 = scmp.lt.s32.totalorder %s4734_s0, 2 }
  0x38   : > { %s2954_s15 = sshll.u32 %s471_s27, 4  ;;  %s3998_s26 = sshll.u32 %s4734_s0, 4 }
  0x39   : > { %s480_s29 = scalar_lea.hbm %s5134_s1, %s3998_s26  ;;  %s475_s14 = scalar_lea.vmem [#allocation4], %s2954_s15 }
  0x3a   : > { %s482_s2 = sshll.u32 %s480_s29, 4  ;;  %s484_s28 = sshll.u32 %s475_s14, 4  ;;  %s483_s2 = int_to_ptr.hbm [resolvable:$true] %s482_s2  ;;  %s485_s28 = int_to_ptr.vmem [resolvable:$true] %s484_s28 }
  0x3b   : > { %p4946_p8 = pnand %p4325_p6, %p58_p2  ;;  %s472_s22 = scalar_lea.sflag [#allocation5], %s471_s27 }
  0x3c   : > { %s4620_s3 = sshra.s32 %s483_s2, 4  ;;  %s4627_s15 = scalar_lea.hbm %s5134_s1, 32  ;;  %s4621_s3 = int_to_ptr.hbm [resolvable:$true] %s4620_s3 }
  0x3d   : > { %s4622_s6 = scalar_lea.hbm %s4621_s3, 16  ;;  %p4624_p9 = pneg %p4946_p8 }
  0x3e   : > { %p4623_p7 = scmp.ne.s32.totalorder %s4621_s3, %s4622_s6  ;;  %p4628_p0 = scmp.lt.s32.totalorder %s4621_s3, %s5134_s1 }
  0x3f   : > { %p4629_p2 = scmp.lt.s32.totalorder %s4627_s15, %s4622_s6 }
  0x40   : > { %p4625_p10 = pnand %p4624_p9, %p4623_p7 }
  0x41   : > { %p4630_p6 = por %p4629_p2, %p4628_p0 }
  0x42   : > { %p4626_p11 = pneg %p4625_p10 }
  0x44   : > { %p4631_p5 = pnand %p4630_p6, %p4626_p11 }
  0x46   : > { %4634 = shalt.err (!%p4631_p5)
}
  0x47   : > { %4313 = dma.hbm_to_vmem [thread:$0]  (!%p4946_p8), %s483_s2, 256, %s485_s28, %s472_s22  }
  0x48   : > { %493 = sbr.rel (%p4859_p3) target bundleno = 1822 (0x71e), region = 72  ;;  %s4963_s27 = sand.u32 (!%p4859_p3), 1, %s4726_s18  }
  0x49   : > { %s2958_s14 = sshll.u32 (!%p4859_p3), %s4963_s27, 4  ;;  %s496_s26 = scalar_lea.sflag (!%p4859_p3), [#allocation5], %s4963_s27 }
  0x4a   : > { %s4969_s3 = scalar_lea.vmem (!%p4859_p3), [#allocation4], %s2958_s14 }
  0x4d   : > { %4697 = dma.done.wait (%p4928_p12), %s496_s26, 256  }
  0x4e   : > { %4699 = vsyncadd (%p4928_p12), %s496_s26, 4294967040 }
  0x4f   : > { %4701 = dma.done.wait (%p63_p1), [#allocation8], 12384  }
  0x50   : > { %4703 = vsyncadd (%p63_p1), [#allocation8], 4294954912 }
  0x51   : > { %4705 = dma.done.wait (%p63_p1), [#allocation11], 4128  }
  0x52   : > { %4707 = vsyncadd (%p63_p1), [#allocation11], 4294963168 }
  0x53   : > { %4709 = dma.done.wait (%p63_p1), [#allocation14], 8224  }
  0x54   : > { %4711 = vsyncadd (%p63_p1), [#allocation14], 4294959072 }
  0x55   : > { %4713 = dma.done.wait (%p63_p1), [#allocation17], 8192  }
  0x56   : > { %4715 = vsyncadd (%p63_p1), [#allocation17], 4294959104  ;;  %v3137_v0 = vld [vmem:[#allocation7 + $0x150] sm:$0xf]  ;;  %v4044_v1 = vld [vmem:[#allocation7 + $0x164] sm:$0xf0] }
  0x57   : > { %v3329_v2 = vld [vmem:[#allocation7 + $0x2d0] sm:$0xf]  ;;  %v3138_v3 = vor.u32 %v4044_v1, %v3137_v0  ;;  %v4092_v4 = vld [vmem:[#allocation7 + $0x2e4] sm:$0xf0]  ;;  %v4041_v5 = vld [vmem:[#allocation7 + $0x154] sm:$0xf] }
  0x58   : > { %v3139_v6 = vld [vmem:[#allocation7 + $0x168] sm:$0xf0]  ;;  %v3330_v7 = vor.u32 %v4092_v4, %v3329_v2  ;;  %v4089_v9 = vld [vmem:[#allocation7 + $0x2d4] sm:$0xf]  ;;  %v3113_v11 = vld [vmem:[#allocation7 + $0x120] sm:$0xf] }
  0x59   : > { %v3142_v8 = vor.u32 %v4041_v5, %v3139_v6  ;;  %v3331_v10 = vld [vmem:[#allocation7 + $0x2e8] sm:$0xf0]  ;;  %1173 = vmatpush.bf16.msra.mxu0 %v3138_v3  ;;  %v4038_v13 = vld [vmem:[#allocation7 + $0x134] sm:$0xf0]  ;;  %v3305_v14 = vld [vmem:[#allocation7 + $0x2a0] sm:$0xf] }
  0x5a   : > { %v3334_v12 = vor.u32 %v4089_v9, %v3331_v10  ;;  %v4086_v15 = vld [vmem:[#allocation7 + $0x2b4] sm:$0xf0]  ;;  %1186 = vmatpush.bf16.msra.mxu1 %v3330_v7  ;;  %v3114_v16 = vor.u32 %v4038_v13, %v3113_v11  ;;  %v4035_v18 = vld [vmem:[#allocation7 + $0x124] sm:$0xf]  ;;  %v3115_v19 = vld [vmem:[#allocation7 + $0x138] sm:$0xf0] }
  0x5b   : > { %1199 = vmatpush.bf16.msra.mxu2 %v3142_v8  ;;  %v3306_v17 = vor.u32 %v4086_v15, %v3305_v14  ;;  %v4083_v20 = vld [vmem:[#allocation7 + $0x2a4] sm:$0xf]  ;;  %v3118_v21 = vor.u32 %v4035_v18, %v3115_v19  ;;  %v3307_v22 = vld [vmem:[#allocation7 + $0x2b8] sm:$0xf0]  ;;  %v3089_v23 = vld [vmem:[#allocation7 + $0xf0] sm:$0xf] }
  0x5c   : > { %1212 = vmatpush.bf16.msra.mxu3 %v3334_v12  ;;  %v4032_v24 = vld [vmem:[#allocation7 + $0x104] sm:$0xf0]  ;;  %v3310_v25 = vor.u32 %v4083_v20, %v3307_v22  ;;  %v3281_v26 = vld [vmem:[#allocation7 + $0x270] sm:$0xf]  ;;  %v4029_v28 = vld [vmem:[#allocation7 + $0xf4] sm:$0xf] }
  0x5d   : > { %v4080_v27 = vld [vmem:[#allocation7 + $0x284] sm:$0xf0]  ;;  %1174 = vmatpush.bf16.msra.mxu0 %v3114_v16  ;;  %v3090_v29 = vor.u32 %v4032_v24, %v3089_v23  ;;  %v3091_v30 = vld [vmem:[#allocation7 + $0x108] sm:$0xf0]  ;;  %v4077_v31 = vld [vmem:[#allocation7 + $0x274] sm:$0xf] }
  0x5e   : > { %v3283_v32 = vld [vmem:[#allocation7 + $0x288] sm:$0xf0]  ;;  %1187 = vmatpush.bf16.msra.mxu1 %v3306_v17  ;;  %v3282_v33 = vor.u32 %v4080_v27, %v3281_v26  ;;  %v3094_v34 = vor.u32 %v4029_v28, %v3091_v30  ;;  %v3065_v35 = vld [vmem:[#allocation7 + $0xc0] sm:$0xf]  ;;  %v4026_v36 = vld [vmem:[#allocation7 + $0xd4] sm:$0xf0] }
  0x5f   : > { %1200 = vmatpush.bf16.msra.mxu2 %v3118_v21  ;;  %v3257_v37 = vld [vmem:[#allocation7 + $0x240] sm:$0xf]  ;;  %v3286_v38 = vor.u32 %v4077_v31, %v3283_v32  ;;  %v4074_v39 = vld [vmem:[#allocation7 + $0x254] sm:$0xf0]  ;;  %v4023_v40 = vld [vmem:[#allocation7 + $0xc4] sm:$0xf]  ;;  %v3066_v44 = vor.u32 %v4026_v36, %v3065_v35 }
  0x60   : > { %1213 = vmatpush.bf16.msra.mxu3 %v3310_v25  ;;  %v3067_v41 = vld [vmem:[#allocation7 + $0xd8] sm:$0xf0]  ;;  %v4071_v42 = vld [vmem:[#allocation7 + $0x244] sm:$0xf]  ;;  %v3258_v45 = vor.u32 %v4074_v39, %v3257_v37  ;;  %v3041_v47 = vld [vmem:[#allocation7 + $0x90] sm:$0xf] }
  0x61   : > { %v3259_v43 = vld [vmem:[#allocation7 + $0x258] sm:$0xf0]  ;;  %1175 = vmatpush.bf16.msra.mxu0 %v3090_v29  ;;  %v3070_v46 = vor.u32 %v4023_v40, %v3067_v41  ;;  %v4020_v48 = vld [vmem:[#allocation7 + $0xa4] sm:$0xf0]  ;;  %v3233_v49 = vld [vmem:[#allocation7 + $0x210] sm:$0xf] }
  0x62   : > { %1188 = vmatpush.bf16.msra.mxu1 %v3282_v33  ;;  %v3262_v50 = vor.u32 %v4071_v42, %v3259_v43  ;;  %v4068_v51 = vld [vmem:[#allocation7 + $0x224] sm:$0xf0]  ;;  %v4017_v52 = vld [vmem:[#allocation7 + $0x94] sm:$0xf]  ;;  %v3043_v53 = vld [vmem:[#allocation7 + $0xa8] sm:$0xf0]  ;;  %v3042_v56 = vor.u32 %v4020_v48, %v3041_v47 }
  0x63   : > { %1201 = vmatpush.bf16.msra.mxu2 %v3094_v34  ;;  %v4065_v54 = vld [vmem:[#allocation7 + $0x214] sm:$0xf]  ;;  %v3235_v55 = vld [vmem:[#allocation7 + $0x228] sm:$0xf0]  ;;  %v3234_v57 = vor.u32 %v4068_v51, %v3233_v49  ;;  %v3046_v58 = vor.u32 %v4017_v52, %v3043_v53  ;;  %v3017_v59 = vld [vmem:[#allocation7 + $0x60] sm:$0xf] }
  0x64   : > { %1214 = vmatpush.bf16.msra.mxu3 %v3286_v38  ;;  %v4014_v60 = vld [vmem:[#allocation7 + $0x74] sm:$0xf0]  ;;  %v3209_v61 = vld [vmem:[#allocation7 + $0x1e0] sm:$0xf]  ;;  %v3238_v62 = vor.u32 %v4065_v54, %v3235_v55  ;;  %v4011_v0 = vld [vmem:[#allocation7 + $0x64] sm:$0xf] }
  0x65   : > { %1176 = vmatpush.bf16.msra.mxu0 %v3066_v44  ;;  %v4062_v63 = vld [vmem:[#allocation7 + $0x1f4] sm:$0xf0]  ;;  %v3019_v1 = vld [vmem:[#allocation7 + $0x78] sm:$0xf0]  ;;  %v4059_v2 = vld [vmem:[#allocation7 + $0x1e4] sm:$0xf]  ;;  %v3018_v4 = vor.u32 %v4014_v60, %v3017_v59 }
  0x66   : > { %1189 = vmatpush.bf16.msra.mxu1 %v3258_v45  ;;  %v3211_v3 = vld [vmem:[#allocation7 + $0x1f8] sm:$0xf0]  ;;  %v3210_v5 = vor.u32 %v4062_v63, %v3209_v61  ;;  %v3022_v6 = vor.u32 %v4011_v0, %v3019_v1  ;;  %v2993_v7 = vld [vmem:[#allocation7 + $0x30] sm:$0xf]  ;;  %v4008_v8 = vld [vmem:[#allocation7 + $0x44] sm:$0xf0] }
  0x67   : > { %1202 = vmatpush.bf16.msra.mxu2 %v3070_v46  ;;  %v3185_v9 = vld [vmem:[#allocation7 + $0x1b0] sm:$0xf]  ;;  %v3214_v10 = vor.u32 %v4059_v2, %v3211_v3  ;;  %v4056_v11 = vld [vmem:[#allocation7 + $0x1c4] sm:$0xf0]  ;;  %v4005_v12 = vld [vmem:[#allocation7 + $0x34] sm:$0xf]  ;;  %v2994_v16 = vor.u32 %v4008_v8, %v2993_v7 }
  0x68   : > { %1215 = vmatpush.bf16.msra.mxu3 %v3262_v50  ;;  %v2995_v13 = vld [vmem:[#allocation7 + $0x48] sm:$0xf0]  ;;  %v4053_v14 = vld [vmem:[#allocation7 + $0x1b4] sm:$0xf]  ;;  %v2969_v17 = vld [vmem:[#allocation7] sm:$0xf]  ;;  %v3186_v19 = vor.u32 %v4056_v11, %v3185_v9 }
  0x69   : > { %1177 = vmatpush.bf16.msra.mxu0 %v3042_v56  ;;  %v3187_v15 = vld [vmem:[#allocation7 + $0x1c8] sm:$0xf0]  ;;  %v4002_v18 = vld [vmem:[#allocation7 + $0x14] sm:$0xf0]  ;;  %v2998_v20 = vor.u32 %v4005_v12, %v2995_v13  ;;  %v3161_v21 = vld [vmem:[#allocation7 + $0x180] sm:$0xf] }
  0x6a   : > { %1190 = vmatpush.bf16.msra.mxu1 %v3234_v57  ;;  %v4050_v22 = vld [vmem:[#allocation7 + $0x194] sm:$0xf0]  ;;  %v3999_v23 = vld [vmem:[#allocation7 + $0x4] sm:$0xf]  ;;  %v3190_v24 = vor.u32 %v4053_v14, %v3187_v15  ;;  %v2971_v25 = vld [vmem:[#allocation7 + $0x18] sm:$0xf0]  ;;  %v2970_v31 = vor.u32 %v4002_v18, %v2969_v17 }
  0x6b   : > { %1203 = vmatpush.bf16.msra.mxu2 %v3046_v58  ;;  %v4047_v26 = vld [vmem:[#allocation7 + $0x184] sm:$0xf]  ;;  %v3163_v27 = vld [vmem:[#allocation7 + $0x198] sm:$0xf0]  ;;  %v3145_v28 = vld [vmem:[#allocation7 + $0x158] sm:$0xf]  ;;  %v3162_v35 = vor.u32 %v4050_v22, %v3161_v21  ;;  %v2974_v36 = vor.u32 %v3999_v23, %v2971_v25 }
  0x6c   : > { %1216 = vmatpush.bf16.msra.mxu3 %v3238_v62  ;;  %v4045_v29 = vld [vmem:[#allocation7 + $0x16c] sm:$0xf0]  ;;  %v3337_v30 = vld [vmem:[#allocation7 + $0x2d8] sm:$0xf]  ;;  %v4042_v33 = vld [vmem:[#allocation7 + $0x15c] sm:$0xf]  ;;  %v3166_v40 = vor.u32 %v4047_v26, %v3163_v27 }
  0x6d   : > { %1178 = vmatpush.bf16.msra.mxu0 %v3018_v4  ;;  %v4093_v32 = vld [vmem:[#allocation7 + $0x2ec] sm:$0xf0]  ;;  %v3147_v34 = vld [vmem:[#allocation7 + $0x170] sm:$0xf0]  ;;  %v4090_v37 = vld [vmem:[#allocation7 + $0x2dc] sm:$0xf]  ;;  %v3146_v41 = vor.u32 %v4045_v29, %v3145_v28 }
  0x6e   : > { %1191 = vmatpush.bf16.msra.mxu1 %v3210_v5  ;;  %v3339_v38 = vld [vmem:[#allocation7 + $0x2f0] sm:$0xf0]  ;;  %v580_v42 = vld [vmem:[%s4969_s3 + $0x8] sm:$0xff]  ;;  %v3338_v43 = vor.u32 %v4093_v32, %v3337_v30  ;;  %v3150_v44 = vor.u32 %v4042_v33, %v3147_v34  ;;  %v4039_v46 = vld [vmem:[#allocation7 + $0x13c] sm:$0xf0]  ;;  %vm1369_vm0 = vcmask 1043456  }
  0x6f   : > { %1204 = vmatpush.bf16.msra.mxu2 %v3022_v6  ;;  %v579_v39 = vld [vmem:[%s4969_s3] sm:$0xff]  ;;  %v3121_v45 = vld [vmem:[#allocation7 + $0x128] sm:$0xf]  ;;  %v3342_v48 = vor.u32 %v4090_v37, %v3339_v38  ;;  %v4036_v50 = vld [vmem:[#allocation7 + $0x12c] sm:$0xf]  ;;  %v4995_v55 = vpack.c.bf16 %v580_v42, %v580_v42  ;;  %s1336_s6 = sld [smem:[#allocation3 + %s4854_s23]] }
  0x70   : > { %1217 = vmatpush.bf16.msra.mxu3 %v3214_v10  ;;  %v3313_v47 = vld [vmem:[#allocation7 + $0x2a8] sm:$0xf]  ;;  %v4087_v49 = vld [vmem:[#allocation7 + $0x2bc] sm:$0xf0]  ;;  %v3123_v51 = vld [vmem:[#allocation7 + $0x140] sm:$0xf0]  ;;  %v4993_v52 = vpack.c.bf16 %v579_v39, %v579_v39  ;;  %v3122_v56 = vor.u32 %v4039_v46, %v3121_v45 }
  0x71   : > { %1179 = vmatpush.bf16.msra.mxu0 %v2994_v16  ;;  %v4084_v53 = vld [vmem:[#allocation7 + $0x2ac] sm:$0xf]  ;;  %v3315_v54 = vld [vmem:[#allocation7 + $0x2c0] sm:$0xf0]  ;;  %v3314_v57 = vor.u32 %v4087_v49, %v3313_v47  ;;  %v3126_v58 = vor.u32 %v4036_v50, %v3123_v51  ;;  %v3097_v59 = vld [vmem:[#allocation7 + $0xf8] sm:$0xf] }
  0x72   : > { %1192 = vmatpush.bf16.msra.mxu1 %v3186_v19  ;;  %v4033_v60 = vld [vmem:[#allocation7 + $0x10c] sm:$0xf0]  ;;  %v3289_v61 = vld [vmem:[#allocation7 + $0x278] sm:$0xf]  ;;  %v3318_v62 = vor.u32 %v4084_v53, %v3315_v54  ;;  %v4030_v0 = vld [vmem:[#allocation7 + $0xfc] sm:$0xf] }
  0x73   : > { %1205 = vmatpush.bf16.msra.mxu2 %v2998_v20  ;;  %v4081_v63 = vld [vmem:[#allocation7 + $0x28c] sm:$0xf0]  ;;  %v3099_v1 = vld [vmem:[#allocation7 + $0x110] sm:$0xf0]  ;;  %v4078_v2 = vld [vmem:[#allocation7 + $0x27c] sm:$0xf]  ;;  %v3098_v4 = vor.u32 %v4033_v60, %v3097_v59 }
  0x74   : > { %1218 = vmatpush.bf16.msra.mxu3 %v3190_v24  ;;  %v3291_v3 = vld [vmem:[#allocation7 + $0x290] sm:$0xf0]  ;;  %v3290_v5 = vor.u32 %v4081_v63, %v3289_v61  ;;  %v3102_v6 = vor.u32 %v4030_v0, %v3099_v1  ;;  %v3073_v7 = vld [vmem:[#allocation7 + $0xc8] sm:$0xf]  ;;  %v4027_v8 = vld [vmem:[#allocation7 + $0xdc] sm:$0xf0] }
  0x75   : > { %1180 = vmatpush.bf16.msra.mxu0 %v2970_v31  ;;  %v3265_v9 = vld [vmem:[#allocation7 + $0x248] sm:$0xf]  ;;  %v3294_v10 = vor.u32 %v4078_v2, %v3291_v3  ;;  %v4075_v11 = vld [vmem:[#allocation7 + $0x25c] sm:$0xf0]  ;;  %v4024_v12 = vld [vmem:[#allocation7 + $0xcc] sm:$0xf]  ;;  %v3074_v16 = vor.u32 %v4027_v8, %v3073_v7 }
  0x76   : > { %1193 = vmatpush.bf16.msra.mxu1 %v3162_v35  ;;  %v3075_v13 = vld [vmem:[#allocation7 + $0xe0] sm:$0xf0]  ;;  %v4072_v14 = vld [vmem:[#allocation7 + $0x24c] sm:$0xf]  ;;  %v3266_v17 = vor.u32 %v4075_v11, %v3265_v9  ;;  %v3049_v19 = vld [vmem:[#allocation7 + $0x98] sm:$0xf] }
  0x77   : > { %1206 = vmatpush.bf16.msra.mxu2 %v2974_v36  ;;  %v3267_v15 = vld [vmem:[#allocation7 + $0x260] sm:$0xf0]  ;;  %v3078_v18 = vor.u32 %v4024_v12, %v3075_v13  ;;  %v4021_v20 = vld [vmem:[#allocation7 + $0xac] sm:$0xf0]  ;;  %v3241_v21 = vld [vmem:[#allocation7 + $0x218] sm:$0xf] }
  0x78   : > { %1219 = vmatpush.bf16.msra.mxu3 %v3166_v40  ;;  %1181 = vmatmul.bf16.vlgmr.msra.gmra.mxu0 %v4993_v52  ;;  %v3270_v22 = vor.u32 %v4072_v14, %v3267_v15  ;;  %v4069_v23 = vld [vmem:[#allocation7 + $0x22c] sm:$0xf0]  ;;  %v4018_v24 = vld [vmem:[#allocation7 + $0x9c] sm:$0xf]  ;;  %v3051_v25 = vld [vmem:[#allocation7 + $0xb0] sm:$0xf0]  ;;  %v3050_v28 = vor.u32 %v4021_v20, %v3049_v19 }
  0x79   : > { %1225 = vmatpush.bf16.msrb.mxu0 %v3146_v41  ;;  %1194 = vmatmul.bf16.vlgmr.msra.gmra.mxu1 %v4995_v55  ;;  %v4066_v26 = vld [vmem:[#allocation7 + $0x21c] sm:$0xf]  ;;  %v3243_v27 = vld [vmem:[#allocation7 + $0x230] sm:$0xf0]  ;;  %v3242_v29 = vor.u32 %v4069_v23, %v3241_v21  ;;  %v3054_v30 = vor.u32 %v4018_v24, %v3051_v25  ;;  %v3025_v31 = vld [vmem:[#allocation7 + $0x68] sm:$0xf] }
  0x7a   : > { %1238 = vmatpush.bf16.msrb.mxu1 %v3338_v43  ;;  %1207 = vmatmul.bf16.vlgmr.msra.gmra.mxu2 %v4993_v52  ;;  %v4015_v32 = vld [vmem:[#allocation7 + $0x7c] sm:$0xf0]  ;;  %v3217_v33 = vld [vmem:[#allocation7 + $0x1e8] sm:$0xf]  ;;  %v3246_v34 = vor.u32 %v4066_v26, %v3243_v27  ;;  %v4012_v36 = vld [vmem:[#allocation7 + $0x6c] sm:$0xf] }
  0x7b   : > { %1251 = vmatpush.bf16.msrb.mxu2 %v3150_v44  ;;  %1220 = vmatmul.bf16.vlgmr.msra.gmra.mxu3 %v4995_v55  ;;  %v4063_v35 = vld [vmem:[#allocation7 + $0x1fc] sm:$0xf0]  ;;  %v3027_v37 = vld [vmem:[#allocation7 + $0x80] sm:$0xf0]  ;;  %v4060_v38 = vld [vmem:[#allocation7 + $0x1ec] sm:$0xf]  ;;  %v3026_v40 = vor.u32 %v4015_v32, %v3025_v31 }
  0x7c   : > { %1264 = vmatpush.bf16.msrb.mxu3 %v3342_v48  ;;  %v3219_v39 = vld [vmem:[#allocation7 + $0x200] sm:$0xf0]  ;;  %v3218_v41 = vor.u32 %v4063_v35, %v3217_v33  ;;  %v3030_v42 = vor.u32 %v4012_v36, %v3027_v37  ;;  %v3001_v43 = vld [vmem:[#allocation7 + $0x38] sm:$0xf]  ;;  %v4009_v44 = vld [vmem:[#allocation7 + $0x4c] sm:$0xf0] }
  0x7d   : > { %1226 = vmatpush.bf16.msrb.mxu0 %v3122_v56  ;;  %v3193_v45 = vld [vmem:[#allocation7 + $0x1b8] sm:$0xf]  ;;  %v3222_v46 = vor.u32 %v4060_v38, %v3219_v39  ;;  %v4057_v47 = vld [vmem:[#allocation7 + $0x1cc] sm:$0xf0]  ;;  %v4006_v48 = vld [vmem:[#allocation7 + $0x3c] sm:$0xf]  ;;  %v3002_v53 = vor.u32 %v4009_v44, %v3001_v43 }
  0x7e   : > { %1239 = vmatpush.bf16.msrb.mxu1 %v3314_v57  ;;  %v3003_v49 = vld [vmem:[#allocation7 + $0x50] sm:$0xf0]  ;;  %v4054_v50 = vld [vmem:[#allocation7 + $0x1bc] sm:$0xf]  ;;  %v2977_v54 = vld [vmem:[#allocation7 + $0x8] sm:$0xf]  ;;  %v3194_v56 = vor.u32 %v4057_v47, %v3193_v45 }
  0x7f   : > { %1252 = vmatpush.bf16.msrb.mxu2 %v3126_v58  ;;  %v3195_v51 = vld [vmem:[#allocation7 + $0x1d0] sm:$0xf0]  ;;  %v3006_v57 = vor.u32 %v4006_v48, %v3003_v49  ;;  %v4003_v58 = vld [vmem:[#allocation7 + $0x1c] sm:$0xf0]  ;;  %v3169_v59 = vld [vmem:[#allocation7 + $0x188] sm:$0xf] }
  0x80   : > { %1265 = vmatpush.bf16.msrb.mxu3 %v3318_v62  ;;  %v4051_v60 = vld [vmem:[#allocation7 + $0x19c] sm:$0xf0]  ;;  %v3198_v61 = vor.u32 %v4054_v50, %v3195_v51  ;;  %v4000_v62 = vld [vmem:[#allocation7 + $0xc] sm:$0xf]  ;;  %v2979_v63 = vld [vmem:[#allocation7 + $0x20] sm:$0xf0] }
  0x81   : > { %1227 = vmatpush.bf16.msrb.mxu0 %v3098_v4  ;;  %v4048_v0 = vld [vmem:[#allocation7 + $0x18c] sm:$0xf]  ;;  %v3171_v1 = vld [vmem:[#allocation7 + $0x1a0] sm:$0xf0]  ;;  %v3153_v2 = vld [vmem:[#allocation7 + $0x160] sm:$0xf]  ;;  %v2978_v4 = vor.u32 %v4003_v58, %v2977_v54  ;;  %v3170_v7 = vor.u32 %v4051_v60, %v3169_v59  ;;  %v2982_v8 = vor.u32 %v4000_v62, %v2979_v63 }
  0x82   : > { %1240 = vmatpush.bf16.msrb.mxu1 %v3290_v5  ;;  %v4046_v3 = vld [vmem:[#allocation7 + $0x174] sm:$0xf0]  ;;  %v4043_v5 = vld [vmem:[#allocation7 + $0x164] sm:$0xf]  ;;  %v3174_v9 = vor.u32 %v4048_v0, %v3171_v1  ;;  %v3129_v11 = vld [vmem:[#allocation7 + $0x130] sm:$0xf] }
  0x83   : > { %1253 = vmatpush.bf16.msrb.mxu2 %v3102_v6  ;;  %v3155_v6 = vld [vmem:[#allocation7 + $0x178] sm:$0xf0]  ;;  %v4040_v12 = vld [vmem:[#allocation7 + $0x144] sm:$0xf0]  ;;  %v4037_v14 = vld [vmem:[#allocation7 + $0x134] sm:$0xf] }
  0x84   : > { %1266 = vmatpush.bf16.msrb.mxu3 %v3294_v10  ;;  %v3154_v10 = vor.u32 %v4046_v3, %v3153_v2  ;;  %v3158_v13 = vor.u32 %v4043_v5, %v3155_v6  ;;  %v3131_v15 = vld [vmem:[#allocation7 + $0x148] sm:$0xf0]  ;;  %v4031_v21 = vld [vmem:[#allocation7 + $0x104] sm:$0xf]  ;;  %v3347_v25 = vld [vmem:[#allocation7 + $0x2f8] sm:$0xf0] }
  0x85   : > { %1228 = vmatpush.bf16.msrb.mxu0 %v3074_v16  ;;  %v3130_v16 = vor.u32 %v4040_v12, %v3129_v11  ;;  %v3134_v19 = vor.u32 %v4037_v14, %v3131_v15  ;;  %v4091_v24 = vld [vmem:[#allocation7 + $0x2e4] sm:$0xf]  ;;  %v4025_v27 = vld [vmem:[#allocation7 + $0xd4] sm:$0xf]  ;;  %v3323_v31 = vld [vmem:[#allocation7 + $0x2c8] sm:$0xf0] }
  0x86   : > { %1241 = vmatpush.bf16.msrb.mxu1 %v3266_v17  ;;  %v3105_v17 = vld [vmem:[#allocation7 + $0x100] sm:$0xf]  ;;  %v3350_v26 = vor.u32 %v4091_v24, %v3347_v25  ;;  %v3081_v33 = vld [vmem:[#allocation7 + $0xd0] sm:$0xf]  ;;  %v4019_v35 = vld [vmem:[#allocation7 + $0xa4] sm:$0xf] }
  0x87   : > { %1254 = vmatpush.bf16.msrb.mxu2 %v3078_v18  ;;  %v4034_v18 = vld [vmem:[#allocation7 + $0x114] sm:$0xf0]  ;;  %v3059_v37 = vld [vmem:[#allocation7 + $0xb8] sm:$0xf0]  ;;  %v3345_v38 = vld [vmem:[#allocation7 + $0x2e0] sm:$0xf] }
  0x88   : > { %1267 = vmatpush.bf16.msrb.mxu3 %v3270_v22  ;;  %v3106_v20 = vor.u32 %v4034_v18, %v3105_v17  ;;  %v3107_v22 = vld [vmem:[#allocation7 + $0x118] sm:$0xf0]  ;;  %v4094_v39 = vld [vmem:[#allocation7 + $0x2f4] sm:$0xf0]  ;;  %v3057_v45 = vld [vmem:[#allocation7 + $0xa0] sm:$0xf] }
  0x89   : > { %1229 = vmatpush.bf16.msrb.mxu0 %v3050_v28  ;;  %v3110_v23 = vor.u32 %v4031_v21, %v3107_v22  ;;  %v3083_v28 = vld [vmem:[#allocation7 + $0xe8] sm:$0xf0]  ;;  %v3299_v43 = vld [vmem:[#allocation7 + $0x298] sm:$0xf0]  ;;  %v3033_v47 = vld [vmem:[#allocation7 + $0x70] sm:$0xf] }
  0x8a   : > { %1242 = vmatpush.bf16.msrb.mxu1 %v3242_v29  ;;  %v3086_v29 = vor.u32 %v4025_v27, %v3083_v28  ;;  %v4016_v49 = vld [vmem:[#allocation7 + $0x84] sm:$0xf0]  ;;  %v3009_v50 = vld [vmem:[#allocation7 + $0x40] sm:$0xf]  ;;  %v4013_v51 = vld [vmem:[#allocation7 + $0x74] sm:$0xf] }
  0x8b   : > { %1255 = vmatpush.bf16.msrb.mxu2 %v3054_v30  ;;  %v4085_v30 = vld [vmem:[#allocation7 + $0x2b4] sm:$0xf]  ;;  %v3321_v54 = vld [vmem:[#allocation7 + $0x2b0] sm:$0xf]  ;;  %v4088_v59 = vld [vmem:[#allocation7 + $0x2c4] sm:$0xf0] }
  0x8c   : > { %1268 = vmatpush.bf16.msrb.mxu3 %v3246_v34  ;;  %v3326_v32 = vor.u32 %v4085_v30, %v3323_v31  ;;  %v4028_v34 = vld [vmem:[#allocation7 + $0xe4] sm:$0xf0]  ;;  %v4073_v60 = vld [vmem:[#allocation7 + $0x254] sm:$0xf]  ;;  %v3275_v62 = vld [vmem:[#allocation7 + $0x268] sm:$0xf0] }
  0x8d   : > { %1230 = vmatpush.bf16.msrb.mxu0 %v3026_v40  ;;  %v3082_v36 = vor.u32 %v4028_v34, %v3081_v33  ;;  %v3062_v40 = vor.u32 %v4019_v35, %v3059_v37  ;;  %v4007_v63 = vld [vmem:[#allocation7 + $0x44] sm:$0xf]  ;;  %v3011_v0 = vld [vmem:[#allocation7 + $0x58] sm:$0xf0]  ;;  %v3278_v1 = vor.u32 %v4073_v60, %v3275_v62  ;;  %v3297_v3 = vld [vmem:[#allocation7 + $0x280] sm:$0xf] }
  0x8e   : > { %1243 = vmatpush.bf16.msrb.mxu1 %v3218_v41  ;;  %v3346_v41 = vor.u32 %v4094_v39, %v3345_v38  ;;  %v3014_v2 = vor.u32 %v4007_v63, %v3011_v0  ;;  %v4067_v6 = vld [vmem:[#allocation7 + $0x224] sm:$0xf]  ;;  %v2987_v11 = vld [vmem:[#allocation7 + $0x28] sm:$0xf0]  ;;  %v3273_v12 = vld [vmem:[#allocation7 + $0x250] sm:$0xf] }
  0x8f   : > { %1256 = vmatpush.bf16.msrb.mxu2 %v3030_v42  ;;  %v4079_v42 = vld [vmem:[#allocation7 + $0x284] sm:$0xf]  ;;  %v4076_v14 = vld [vmem:[#allocation7 + $0x264] sm:$0xf0]  ;;  %v3227_v17 = vld [vmem:[#allocation7 + $0x208] sm:$0xf0] }
  0x90   : > { %1269 = vmatpush.bf16.msrb.mxu3 %v3222_v46  ;;  %v3302_v44 = vor.u32 %v4079_v42, %v3299_v43  ;;  %v4022_v46 = vld [vmem:[#allocation7 + $0xb4] sm:$0xf0]  ;;  %v3274_v15 = vor.u32 %v4076_v14, %v3273_v12  ;;  %v3249_v21 = vld [vmem:[#allocation7 + $0x220] sm:$0xf]  ;;  %v4055_v25 = vld [vmem:[#allocation7 + $0x1c4] sm:$0xf] }
  0x91   : > { %1231 = vmatpush.bf16.msrb.mxu0 %v3002_v53  ;;  %v3058_v48 = vor.u32 %v4022_v46, %v3057_v45  ;;  %v3035_v53 = vld [vmem:[#allocation7 + $0x88] sm:$0xf0]  ;;  %v4064_v30 = vld [vmem:[#allocation7 + $0x204] sm:$0xf0]  ;;  %v4049_v33 = vld [vmem:[#allocation7 + $0x194] sm:$0xf] }
  0x92   : > { %1244 = vmatpush.bf16.msrb.mxu1 %v3194_v56  ;;  %v3034_v56 = vor.u32 %v4016_v49, %v3033_v47  ;;  %v3038_v58 = vor.u32 %v4013_v51, %v3035_v53  ;;  %v3179_v34 = vld [vmem:[#allocation7 + $0x1a8] sm:$0xf0]  ;;  %v4058_v37 = vld [vmem:[#allocation7 + $0x1d4] sm:$0xf0]  ;;  %v3177_v42 = vld [vmem:[#allocation7 + $0x190] sm:$0xf] }
  0x93   : > { %1257 = vmatpush.bf16.msrb.mxu2 %v3006_v57  ;;  %v4010_v57 = vld [vmem:[#allocation7 + $0x54] sm:$0xf0]  ;;  %v3182_v35 = vor.u32 %v4049_v33, %v3179_v34  ;;  %v4052_v43 = vld [vmem:[#allocation7 + $0x1a4] sm:$0xf0]  ;;  %v679_v47 = vld [vmem:[#allocation9] sm:$0x3f] }
  0x94   : > { %1270 = vmatpush.bf16.msrb.mxu3 %v3198_v61  ;;  %v3322_v61 = vor.u32 %v4088_v59, %v3321_v54  ;;  %v682_v49 = vperm.slane %v679_v47, 1  ;;  %vm1353_vm2 = vcmask 64512   ;;  %s5166_s21 = sld [smem:[#allocation30_spill]]  ;;  %s577_s16 = scalar_lea.vmem [#allocation18], %s2958_s14 }
  0x95   : > { %1232 = vmatpush.bf16.msrb.mxu0 %v2978_v4  ;;  %v4082_v4 = vld [vmem:[#allocation7 + $0x294] sm:$0xf0]  ;;  %s5168_s2 = sld [smem:[#allocation32_spill]]  ;;  %s2804_s22 = sshll.u32 %s577_s16, 4  ;;  %s2805_s22 = int_to_ptr.vmem [resolvable:$true] %s2804_s22 }
  0x96   : > { %1245 = vmatpush.bf16.msrb.mxu1 %v3170_v7  ;;  %v3298_v5 = vor.u32 %v4082_v4, %v3297_v3  ;;  %v3251_v7 = vld [vmem:[#allocation7 + $0x238] sm:$0xf0] }
  0x97   : > { %1258 = vmatpush.bf16.msrb.mxu2 %v2982_v8  ;;  %v3010_v8 = vor.u32 %v4010_v57, %v3009_v50  ;;  %v683_v50 = vperm.slane %v679_v47, 2 }
  0x98   : > { %1271 = vmatpush.bf16.msrb.mxu3 %v3174_v9  ;;  %1233 = vmatmul.bf16.vlgmr.msrb.gmra.mxu0 %v4993_v52  ;;  %v3254_v9 = vor.u32 %v4067_v6, %v3251_v7 }
  0x99   : > { %1277 = vmatpush.bf16.msra.mxu0 %v3154_v10  ;;  %1246 = vmatmul.bf16.vlgmr.msrb.gmra.mxu1 %v4995_v55  ;;  %v4001_v10 = vld [vmem:[#allocation7 + $0x14] sm:$0xf] }
  0x9a   : > { %1259 = vmatmul.bf16.vlgmr.msrb.gmra.mxu2 %v4993_v52  ;;  %1290 = vmatpush.bf16.msra.mxu1 %v3346_v41 }
  0x9b   : > { %1303 = vmatpush.bf16.msra.mxu2 %v3158_v13  ;;  %1272 = vmatmul.bf16.vlgmr.msrb.gmra.mxu3 %v4995_v55  ;;  %v2990_v13 = vor.u32 %v4001_v10, %v2987_v11  ;;  %s4670_s26 = scalar_lea.hbm %s5168_s2, 32 }
  0x9c   : > { %1316 = vmatpush.bf16.msra.mxu3 %v3350_v26  ;;  %v3203_v26 = vld [vmem:[#allocation7 + $0x1d8] sm:$0xf0] }
  0x9d   : > { %1278 = vmatpush.bf16.msra.mxu0 %v3130_v16  ;;  %v4061_v16 = vld [vmem:[#allocation7 + $0x1f4] sm:$0xf]  ;;  %v3206_v27 = vor.u32 %v4055_v25, %v3203_v26 }
  0x9e   : > { %1291 = vmatpush.bf16.msra.mxu1 %v3322_v61  ;;  %v3230_v18 = vor.u32 %v4061_v16, %v3227_v17  ;;  %v685_v16 = vperm.slane %v679_v47, 4 }
  0x9f   : > { %1304 = vmatpush.bf16.msra.mxu2 %v3134_v19  ;;  %v2985_v19 = vld [vmem:[#allocation7 + $0x10] sm:$0xf] }
  0xa0   : > { %1317 = vmatpush.bf16.msra.mxu3 %v3326_v32 }
  0xa1   : > { %1279 = vmatpush.bf16.msra.mxu0 %v3106_v20  ;;  %v4004_v20 = vld [vmem:[#allocation7 + $0x24] sm:$0xf0] }
  0xa2   : > { %1292 = vmatpush.bf16.msra.mxu1 %v3298_v5  ;;  %v2986_v22 = vor.u32 %v4004_v20, %v2985_v19 }
  0xa3   : > { %1305 = vmatpush.bf16.msra.mxu2 %v3110_v23  ;;  %v4070_v23 = vld [vmem:[#allocation7 + $0x234] sm:$0xf0] }
  0xa4   : > { %1318 = vmatpush.bf16.msra.mxu3 %v3302_v44  ;;  %v3250_v24 = vor.u32 %v4070_v23, %v3249_v21 }
  0xa5   : > { %1280 = vmatpush.bf16.msra.mxu0 %v3082_v36  ;;  %v3201_v36 = vld [vmem:[#allocation7 + $0x1c0] sm:$0xf] }
  0xa6   : > { %1293 = vmatpush.bf16.msra.mxu1 %v3274_v15  ;;  %v686_v15 = vperm.slane %v679_v47, 5 }
  0xa7   : > { %1306 = vmatpush.bf16.msra.mxu2 %v3086_v29  ;;  %v3225_v29 = vld [vmem:[#allocation7 + $0x1f0] sm:$0xf] }
  0xa8   : > { %1319 = vmatpush.bf16.msra.mxu3 %v3278_v1  ;;  %v3226_v32 = vor.u32 %v4064_v30, %v3225_v29 }
  0xa9   : > { %1281 = vmatpush.bf16.msra.mxu0 %v3058_v48  ;;  %v681_v48 = vperm.slane %v679_v47, 0 }
  0xaa   : > { %1294 = vmatpush.bf16.msra.mxu1 %v3250_v24 }
  0xab   : > { %1307 = vmatpush.bf16.msra.mxu2 %v3062_v40  ;;  %v3202_v40 = vor.u32 %v4058_v37, %v3201_v36  ;;  %v4750_v37 = vmov -1e+20  }
  0xac   : > { %1320 = vmatpush.bf16.msra.mxu3 %v3254_v9 }
  0xad   : > { %1282 = vmatpush.bf16.msra.mxu0 %v3034_v56 }
  0xae   : > { %1295 = vmatpush.bf16.msra.mxu1 %v3226_v32  ;;  %v1334_v32 = vlaneseq }
  0xaf   : > { %1308 = vmatpush.bf16.msra.mxu2 %v3038_v58  ;;  %v684_v58 = vperm.slane %v679_v47, 3 }
  0xb0   : > { %1321 = vmatpush.bf16.msra.mxu3 %v3230_v18  ;;  %v1335_v34 = vand.u32 127, %v1334_v32  ;;  %v4104_v32 = vld [vmem:[#allocation10 + $0x44] sm:$0xf0] }
  0xb1   : > { %1283 = vmatpush.bf16.msra.mxu0 %v3010_v8 }
  0xb2   : > { %1296 = vmatpush.bf16.msra.mxu1 %v3202_v40 }
  0xb3   : > { %1309 = vmatpush.bf16.msra.mxu2 %v3014_v2 }
  0xb4   : > { %1322 = vmatpush.bf16.msra.mxu3 %v3206_v27 }
  0xb5   : > { %1284 = vmatpush.bf16.msra.mxu0 %v2986_v22 }
  0xb7   : > { %1310 = vmatpush.bf16.msra.mxu2 %v2990_v13 }
  0xb8   : > { %1285 = vmatmul.bf16.vlgmr.msra.gmra.mxu0 %v4993_v52  ;;  %1323 = vmatpush.bf16.msra.mxu3 %v3182_v35  ;;  %v1337_v35 = vstv %s1336_s6  ;;  %s4255_s6 = sshll.u32 %s4854_s23, 4  ;;  %s2791_s23 = scalar_lea.sflag [#allocation6], %s4963_s27 }
  0xb9   : > { %vm1338_vm1 = vcmp.lt.s32.totalorder %v1335_v34, %v1337_v35  ;;  %v3389_v34 = vld [vmem:[#allocation10 + $0x48] sm:$0xf0]  ;;  %s2802_s28 = scalar_lea.hbm %s5168_s2, %s4255_s6 }
  0xba   : > { %1311 = vmatmul.bf16.vlgmr.msra.gmra.mxu2 %v4993_v52  ;;  %v3178_v52 = vor.u32 %v4052_v43, %v3177_v42  ;;  %s2806_s20 = sshll.u32 %s2802_s28, 4  ;;  %s2807_s20 = int_to_ptr.hbm [resolvable:$true] %s2806_s20 }
  0xbb   : > { %1324 = vmatmul.bf16.vlgmr.msra.gmra.mxu3 %v4995_v55  ;;  %s4664_s15 = sshra.s32 %s2807_s20, 4  ;;  %s4665_s15 = int_to_ptr.hbm [resolvable:$true] %s4664_s15 }
  0xbc   : > { %1297 = vmatpush.bf16.msra.mxu1 %v3178_v52  ;;  %p4671_p12 = scmp.lt.s32.totalorder %s4665_s15, %s5168_s2 }
  0xbf   : > { %1298 = vmatmul.bf16.vlgmr.msra.gmra.mxu1 %v4995_v55 }
  0xf5   : > { %v1182_v28 = vpop.f32.mrf.mxu0 }
  0xf6   : > { %v1195_v31 = vpop.f32.mrf.mxu1  ;;  %v1183_v54 = vadd.f32 %v1182_v28, %v681_v48 }
  0xf8   : > { %v1196_v59 = vadd.f32 %v1195_v31, %v1183_v54 }
  0xfa   : > { %v1329_v55 = vmul.f32 0.088388346, %v1196_v59 }
  0xfd   : > { %v1208_v38 = vpop.f32.mrf.mxu2  ;;  %v1184_v41 = vpop.f32.mrf.mxu0 }
  0xfe   : > { %v1221_v39 = vpop.f32.mrf.mxu3  ;;  %v1197_v44 = vpop.f32.mrf.mxu1  ;;  %v1209_v56 = vadd.f32 %v1208_v38, %v682_v49  ;;  %v1339_v38 = vsel %vm1338_vm1, 0.0, %v4750_v37 }
 0x100   : > { %v1222_v60 = vadd.f32 %v1221_v39, %v1209_v56  ;;  %v3475_v56 = vld [vmem:[#allocation10 + $0xf0] sm:$0xf] }
 0x102   : > { %v1330_v4 = vmul.f32 0.088388346, %v1222_v60  ;;  %v3477_v60 = vld [vmem:[#allocation10 + $0xf8] sm:$0xf0] }
 0x104   : > { %v1331_v7 = vpack.c.bf16 %v1330_v4, %v1329_v55  ;;  %v4124_v4 = vld [vmem:[#allocation10 + $0xe4] sm:$0xf0] }
 0x105   : > { %v1210_v45 = vpop.f32.mrf.mxu2 }
 0x106   : > { %v1223_v46 = vpop.f32.mrf.mxu3  ;;  %v1387_v11 = vunpack.c.h.b16 %v1331_v7 }
 0x108   : > { %v1388_v12 = vpack.c.b16 %v1387_v11, %v1387_v11  ;;  %v4107_v11 = vld [vmem:[#allocation10 + $0x64] sm:$0xf] }
 0x115   : > { %v1234_v51 = vpop.f32.mrf.mxu0 }
 0x116   : > { %v1247_v53 = vpop.f32.mrf.mxu1  ;;  %v1235_v57 = vadd.f32 %v1234_v51, %v683_v50 }
 0x118   : > { %v1248_v62 = vadd.f32 %v1247_v53, %v1235_v57  ;;  %v4126_v57 = vld [vmem:[#allocation10 + $0xf4] sm:$0xf0] }
 0x119   : > { %v3476_v59 = vor.u32 %v4126_v57, %v3475_v56  ;;  %v4115_v57 = vld [vmem:[#allocation10 + $0xa4] sm:$0xf] }
 0x11d   : > { %v1260_v61 = vpop.f32.mrf.mxu2  ;;  %v1236_v1 = vpop.f32.mrf.mxu0 }
 0x11e   : > { %v1261_v63 = vadd.f32 %v1260_v61, %v684_v58  ;;  %v1273_v0 = vpop.f32.mrf.mxu3  ;;  %v1249_v2 = vpop.f32.mrf.mxu1  ;;  %v4125_v58 = vld [vmem:[#allocation10 + $0xf4] sm:$0xf]  ;;  %v3411_v61 = vld [vmem:[#allocation10 + $0x70] sm:$0xf] }
 0x11f   : > { %v4109_v1 = vld [vmem:[#allocation10 + $0x74] sm:$0xf]  ;;  %v3413_v2 = vld [vmem:[#allocation10 + $0x78] sm:$0xf0] }
 0x120   : > { %v1274_v3 = vadd.f32 %v1273_v0, %v1261_v63  ;;  %v3480_v63 = vor.u32 %v4125_v58, %v3477_v60  ;;  %v3416_v55 = vor.u32 %v4109_v1, %v3413_v2  ;;  %v3371_v58 = vld [vmem:[#allocation10 + $0x20] sm:$0xf]  ;;  %v3437_v60 = vld [vmem:[#allocation10 + $0xa8] sm:$0xf0] }
 0x122   : > { %v1332_v5 = vpack.c.bf16 %v1274_v3, %v1248_v62  ;;  %v4110_v62 = vld [vmem:[#allocation10 + $0x74] sm:$0xf0]  ;;  %v3467_v3 = vld [vmem:[#allocation10 + $0xe0] sm:$0xf] }
 0x123   : > { %v3412_v0 = vor.u32 %v4110_v62, %v3411_v61  ;;  %v4099_v61 = vld [vmem:[#allocation10 + $0x24] sm:$0xf]  ;;  %v3373_v62 = vld [vmem:[#allocation10 + $0x28] sm:$0xf0] }
 0x124   : > { %v1391_v6 = vunpack.c.h.b16 %v1332_v5  ;;  %1347 = vmatpush.bf16.xpose.msrb.mxu0 %v1332_v5  ;;  %v4123_v5 = vld [vmem:[#allocation10 + $0xe4] sm:$0xf] }
 0x125   : > { %v1262_v8 = vpop.f32.mrf.mxu2 }
 0x126   : > { %v1392_v9 = vpack.c.b16 %v1391_v6, %v1391_v6  ;;  %v1275_v10 = vpop.f32.mrf.mxu3  ;;  %v3469_v6 = vld [vmem:[#allocation10 + $0xe8] sm:$0xf0] }
 0x127   : > { %v3472_v8 = vor.u32 %v4123_v5, %v3469_v6  ;;  %v4108_v10 = vld [vmem:[#allocation10 + $0x64] sm:$0xf0]  ;;  %v3440_v5 = vor.u32 %v4115_v57, %v3437_v60  ;;  %v3376_v6 = vor.u32 %v4099_v61, %v3373_v62  ;;  %v4157_v60 = vld [vmem:[#allocation15 + $0xec] sm:$0xf0]  ;;  %v3723_v61 = vld [vmem:[#allocation15 + $0x1e0] sm:$0xf] }
 0x128   : > { %1401 = vmatpush.bf16.xpose.msrb.mxu2 %v1392_v9  ;;  %v3403_v9 = vld [vmem:[#allocation10 + $0x60] sm:$0xf] }
 0x12b   : > { %1348 = vmatmul.bf16.vlgmr.msrb.gmra.mxu0 %v1331_v7  ;;  %v3468_v7 = vor.u32 %v4124_v4, %v3467_v3  ;;  %v4114_v4 = vld [vmem:[#allocation10 + $0x94] sm:$0xf0] }
 0x12c   : > { %1641 = vmatpush.bf16.msra.mxu0 %v3412_v0 }
 0x12f   : > { %1402 = vmatmul.bf16.vlgmr.msrb.gmra.mxu2 %v1388_v12  ;;  %v3404_v12 = vor.u32 %v4108_v10, %v3403_v9  ;;  %v4098_v9 = vld [vmem:[#allocation10 + $0x14] sm:$0xf0] }
 0x130   : > { %1667 = vmatpush.bf16.msra.mxu2 %v3416_v55  ;;  %v3427_v55 = vld [vmem:[#allocation10 + $0x90] sm:$0xf] }
 0x131   : > { %1642 = vmatpush.bf16.msra.mxu0 %v3404_v12  ;;  %v4097_v12 = vld [vmem:[#allocation10 + $0x14] sm:$0xf] }
 0x135   : > { %v1286_v13 = vpop.f32.mrf.mxu0 }
 0x136   : > { %v1287_v19 = vadd.f32 %v1286_v13, %v685_v16  ;;  %v3405_v13 = vld [vmem:[#allocation10 + $0x68] sm:$0xf0] }
 0x137   : > { %v3408_v16 = vor.u32 %v4107_v11, %v3405_v13  ;;  %v3429_v11 = vld [vmem:[#allocation10 + $0x98] sm:$0xf0] }
 0x138   : > { %v3365_v13 = vld [vmem:[#allocation10 + $0x18] sm:$0xf0] }
 0x139   : > { %1668 = vmatpush.bf16.msra.mxu2 %v3408_v16  ;;  %v3368_v16 = vor.u32 %v4097_v12, %v3365_v13  ;;  %v4151_v12 = vld [vmem:[#allocation15 + $0xc4] sm:$0xf]  ;;  %v3581_v13 = vld [vmem:[#allocation15 + $0xd0] sm:$0xf0] }
 0x13c   : > { %v1299_v22 = vpop.f32.mrf.mxu1 }
 0x13d   : > { %v1312_v14 = vpop.f32.mrf.mxu2  ;;  %v1288_v17 = vpop.f32.mrf.mxu0  ;;  %v1300_v24 = vadd.f32 %v1299_v22, %v1287_v19  ;;  %v3395_v19 = vld [vmem:[#allocation10 + $0x50] sm:$0xf]  ;;  %v4105_v22 = vld [vmem:[#allocation10 + $0x54] sm:$0xf] }
 0x13e   : > { %v1313_v18 = vadd.f32 %v1312_v14, %v686_v15  ;;  %v1325_v21 = vpop.f32.mrf.mxu3  ;;  %v3459_v14 = vld [vmem:[#allocation10 + $0xd0] sm:$0xf]  ;;  %v4122_v15 = vld [vmem:[#allocation10 + $0xd4] sm:$0xf0]  ;;  %v4121_v17 = vld [vmem:[#allocation10 + $0xd4] sm:$0xf] }
 0x140   : > { %v1326_v23 = vadd.f32 %v1325_v21, %v1313_v18  ;;  %v3461_v18 = vld [vmem:[#allocation10 + $0xd8] sm:$0xf0]  ;;  %v4106_v21 = vld [vmem:[#allocation10 + $0x54] sm:$0xf0] }
 0x142   : > { %v1333_v25 = vpack.c.bf16 %v1326_v23, %v1300_v24  ;;  %v3397_v23 = vld [vmem:[#allocation10 + $0x58] sm:$0xf0]  ;;  %v3464_v24 = vor.u32 %v4121_v17, %v3461_v18 }
 0x144   : > { %v1420_v26 = vunpack.c.h.b16 %v1333_v25  ;;  %v1371_v27 = vsel %vm1369_vm0, %v1333_v25, 0  ;;  %v1301_v30 = vpop.f32.mrf.mxu1  ;;  %v3396_v25 = vor.u32 %v4106_v21, %v3395_v19  ;;  %v4112_v21 = vld [vmem:[#allocation10 + $0x84] sm:$0xf0] }
 0x145   : > { %v1314_v20 = vpop.f32.mrf.mxu2  ;;  %1380 = vmatpush.bf16.msrb.mxu1 %v1371_v27  ;;  %v4120_v27 = vld [vmem:[#allocation10 + $0xc4] sm:$0xf0]  ;;  %v3453_v30 = vld [vmem:[#allocation10 + $0xc8] sm:$0xf0] }
 0x146   : > { %v1421_v28 = vpack.c.b16 %v1420_v26, %v1420_v26  ;;  %v1327_v29 = vpop.f32.mrf.mxu3  ;;  %v3460_v20 = vor.u32 %v4122_v15, %v3459_v14  ;;  %v3451_v26 = vld [vmem:[#allocation10 + $0xc0] sm:$0xf]  ;;  %1643 = vmatpush.bf16.msra.mxu0 %v3396_v25  ;;  %v3428_v14 = vor.u32 %v4114_v4, %v3427_v55  ;;  %v4187_v55 = vld [vmem:[#allocation15 + $0x1e4] sm:$0xf]  ;;  %v3725_v4 = vld [vmem:[#allocation15 + $0x1f0] sm:$0xf0] }
 0x147   : > { %v3400_v29 = vor.u32 %v4105_v22, %v3397_v23  ;;  %v3452_v35 = vor.u32 %v4120_v27, %v3451_v26  ;;  %v4111_v22 = vld [vmem:[#allocation10 + $0x84] sm:$0xf]  ;;  %v3355_v26 = vld [vmem:[#allocation10] sm:$0xf]  ;;  %v4096_v27 = vld [vmem:[#allocation10 + $0x4] sm:$0xf0] }
 0x148   : > { %v1426_v31 = vsel %vm1369_vm0, %v1421_v28, 0  ;;  %v4119_v28 = vld [vmem:[#allocation10 + $0xc4] sm:$0xf] }
 0x149   : > { %1435 = vmatpush.bf16.msrb.mxu3 %v1426_v31  ;;  %1654 = vmatpush.bf16.msra.mxu1 %v3476_v59  ;;  %v3387_v31 = vld [vmem:[#allocation10 + $0x40] sm:$0xf]  ;;  %v3456_v37 = vor.u32 %v4119_v28, %v3453_v30  ;;  %v4100_v59 = vld [vmem:[#allocation10 + $0x24] sm:$0xf0]  ;;  %v4095_v28 = vld [vmem:[#allocation10 + $0x4] sm:$0xf] }
 0x14a   : > { %1669 = vmatpush.bf16.msra.mxu2 %v3400_v29  ;;  %v3372_v3 = vor.u32 %v4100_v59, %v3371_v58  ;;  %v3356_v29 = vor.u32 %v4096_v27, %v3355_v26  ;;  %v3357_v30 = vld [vmem:[#allocation10 + $0x8] sm:$0xf0]  ;;  %v3595_v59 = vld [vmem:[#allocation15 + $0xe0] sm:$0xf] }
 0x14b   : > { %v3596_v62 = vor.u32 %v4157_v60, %v3595_v59  ;;  %v4139_v59 = vld [vmem:[#allocation15 + $0x64] sm:$0xf]  ;;  %v3533_v60 = vld [vmem:[#allocation15 + $0x70] sm:$0xf0] }
 0x14d   : > { %1680 = vmatpush.bf16.msra.mxu3 %v3480_v63  ;;  %1655 = vmatpush.bf16.msra.mxu1 %v3468_v7  ;;  %v4113_v7 = vld [vmem:[#allocation10 + $0x94] sm:$0xf] }
 0x14e   : > { %v3432_v15 = vor.u32 %v4113_v7, %v3429_v11  ;;  %v4153_v7 = vld [vmem:[#allocation15 + $0xcc] sm:$0xf0] }
 0x151   : > { %1681 = vmatpush.bf16.msra.mxu3 %v3472_v8  ;;  %1656 = vmatpush.bf16.msra.mxu1 %v3460_v20  ;;  %v3363_v8 = vld [vmem:[#allocation10 + $0x10] sm:$0xf]  ;;  %v3419_v20 = vld [vmem:[#allocation10 + $0x80] sm:$0xf] }
 0x152   : > { %v3420_v23 = vor.u32 %v4112_v21, %v3419_v20  ;;  %v4181_v20 = vld [vmem:[#allocation15 + $0x1ac] sm:$0xf0]  ;;  %v4147_v21 = vld [vmem:[#allocation15 + $0xa4] sm:$0xf] }
 0x155   : > { %1682 = vmatpush.bf16.msra.mxu3 %v3464_v24  ;;  %1657 = vmatpush.bf16.msra.mxu1 %v3452_v35  ;;  %v3421_v24 = vld [vmem:[#allocation10 + $0x88] sm:$0xf0] }
 0x156   : > { %v3424_v25 = vor.u32 %v4111_v22, %v3421_v24  ;;  %v4179_v24 = vld [vmem:[#allocation15 + $0x1a4] sm:$0xf] }
 0x159   : > { %1683 = vmatpush.bf16.msra.mxu3 %v3456_v37 }
 0x1a8   : > { %v1349_v33 = vpop.f32.mrf.mxu0 }
 0x1a9   : > { %v1350_v42 = vadd.f32 %v1349_v33, %v1339_v38  ;;  %v4103_v33 = vld [vmem:[#allocation10 + $0x44] sm:$0xf] }
 0x1ab   : > { %v1354_v44 = vsel %vm1353_vm2, %v1350_v42, -inf }
 0x1b0   : > { %v1351_v36 = vpop.f32.mrf.mxu0 }
 0x1b2   : > { %v1403_v39 = vpop.f32.mrf.mxu2 }
 0x1b3   : > { %v1404_v40 = vadd.f32 %v1403_v39, %v1339_v38  ;;  %v3388_v38 = vor.u32 %v4104_v32, %v3387_v31  ;;  %v3443_v39 = vld [vmem:[#allocation10 + $0xb0] sm:$0xf] }
 0x1b5   : > { %v1407_v41 = vsel %vm1353_vm2, %v1404_v40, -inf  ;;  %1644 = vmatpush.bf16.msra.mxu0 %v3388_v38  ;;  %v1475_v38 = vld [vmem:[%s5138_s5] sm:$0x3] }
 0x1b6   : > { %1408 = vmax.xlane.f32.xlu0 %v1407_v41  ;;  %v4117_v41 = vld [vmem:[#allocation10 + $0xb4] sm:$0xf] }
 0x1ba   : > { %v1405_v43 = vpop.f32.mrf.mxu2 }
 0x1bb   : > { %v3445_v43 = vld [vmem:[#allocation10 + $0xb8] sm:$0xf0] }
 0x1be   : > { %1355 = vmax.xlane.f32.xlu0 %v1354_v44  ;;  %v3379_v44 = vld [vmem:[#allocation10 + $0x30] sm:$0xf] }
 0x229   : > { %v1409_v52 = vpop.xlane.xlu0 %1408 }
 0x22a   : > { %v1410_v45 = vsub.f32 %v1404_v40, %v1409_v52  ;;  %v4118_v40 = vld [vmem:[#allocation10 + $0xb4] sm:$0xf0] }
 0x22b   : > { %v4102_v52 = vld [vmem:[#allocation10 + $0x34] sm:$0xf0] }
 0x22c   : > { %v1411_v46 = vmul.f32 1.442695, %v1410_v45  ;;  %v4101_v45 = vld [vmem:[#allocation10 + $0x34] sm:$0xf] }
 0x22e   : > { %4382 = vpow2.f32 %v1411_v46  ;;  %v3381_v46 = vld [vmem:[#allocation10 + $0x38] sm:$0xf0] }
 0x22f   : > { %v3384_v56 = vor.u32 %v4101_v45, %v3381_v46 }
 0x231   : > { %v1356_v47 = vpop.xlane.xlu0 %1355 }
 0x232   : > { %v1357_v48 = vsub.f32 %v1350_v42, %v1356_v47  ;;  %v3392_v42 = vor.u32 %v4103_v33, %v3389_v34  ;;  %v3444_v47 = vor.u32 %v4118_v40, %v3443_v39  ;;  %v1477_v40 = vperm.slane %v1475_v38, 0 }
 0x234   : > { %v5012_v49 = vpop.eup %4382  ;;  %v1358_v50 = vmul.f32 1.442695, %v1357_v48  ;;  %v3448_v48 = vor.u32 %v4117_v41, %v3445_v43  ;;  %1670 = vmatpush.bf16.msra.mxu2 %v3392_v42  ;;  %1658 = vmatpush.bf16.msra.mxu1 %v3444_v47  ;;  %v1478_v41 = vperm.slane %v1475_v38, 1 }
 0x235   : > { %v1413_v51 = vsel %vm1353_vm2, %v5012_v49, 0.0 }
 0x236   : > { %4384 = vpow2.f32 %v1358_v50  ;;  %1414 = vadd.xlane.f32.xlu1 %v1413_v51  ;;  %v3380_v50 = vor.u32 %v4102_v52, %v3379_v44  ;;  %v3435_v51 = vld [vmem:[#allocation10 + $0xa0] sm:$0xf]  ;;  %1684 = vmatpush.bf16.msra.mxu3 %v3448_v48 }
 0x238   : > { %1645 = vmatpush.bf16.msra.mxu0 %v3380_v50  ;;  %1671 = vmatpush.bf16.msra.mxu2 %v3384_v56  ;;  %v4751_v56 = vmov 256.0  }
 0x23a   : > { %1685 = vmatpush.bf16.msra.mxu3 %v3440_v5  ;;  %v3579_v5 = vld [vmem:[#allocation15 + $0xc0] sm:$0xf] }
 0x23c   : > { %v5016_v53 = vpop.eup %4384  ;;  %1646 = vmatpush.bf16.msra.mxu0 %v3372_v3  ;;  %1672 = vmatpush.bf16.msra.mxu2 %v3376_v6  ;;  %v3728_v6 = vor.u32 %v4187_v55, %v3725_v4  ;;  %v3643_v55 = vld [vmem:[#allocation15 + $0x140] sm:$0xf] }
 0x23d   : > { %v1360_v54 = vsel %vm1353_vm2, %v5016_v53, 0.0 }
 0x23e   : > { %1361 = vadd.xlane.f32.xlu1 %v1360_v54  ;;  %v4116_v54 = vld [vmem:[#allocation10 + $0xa4] sm:$0xf0]  ;;  %1686 = vmatpush.bf16.msra.mxu3 %v3432_v15  ;;  %v3709_v15 = vld [vmem:[#allocation15 + $0x1d0] sm:$0xf0] }
 0x23f   : > { %v3436_v0 = vor.u32 %v4116_v54, %v3435_v51 }
 0x240   : > { %1673 = vmatpush.bf16.msra.mxu2 %v3368_v16  ;;  %v3563_v16 = vld [vmem:[#allocation15 + $0xa0] sm:$0xf] }
 0x241   : > { %1659 = vmatpush.bf16.msra.mxu1 %v3436_v0  ;;  %v4155_v0 = vld [vmem:[#allocation15 + $0xe4] sm:$0xf] }
 0x242   : > { %1687 = vmatpush.bf16.msra.mxu3 %v3424_v25  ;;  %v3693_v25 = vld [vmem:[#allocation15 + $0x1b0] sm:$0xf0] }
 0x245   : > { %1660 = vmatpush.bf16.msra.mxu1 %v3428_v14  ;;  %v4183_v14 = vld [vmem:[#allocation15 + $0x1c4] sm:$0xf] }
 0x249   : > { %1661 = vmatpush.bf16.msra.mxu1 %v3420_v23  ;;  %v3565_v23 = vld [vmem:[#allocation15 + $0xb0] sm:$0xf0] }
 0x24a   : > { %v3568_v27 = vor.u32 %v4147_v21, %v3565_v23  ;;  %v4163_v21 = vld [vmem:[#allocation15 + $0x124] sm:$0xf] }
 0x2a9   : > { %v1415_v36 = vpop.xlane.xlu1 %1414 }
 0x2aa   : > { %4386 = vrcp.f32 %v1415_v36 }
 0x2b0   : > { %v4387_v63 = vpop.eup %4386 }
 0x2b1   : > { %v1417_v1 = vmul.f32 %v4387_v63, %v5012_v49  ;;  %v1362_v2 = vpop.xlane.xlu1 %1361  ;;  %v3364_v49 = vor.u32 %v4098_v9, %v3363_v8  ;;  %v4189_v63 = vld [vmem:[#allocation15 + $0x1ec] sm:$0xf0]  ;;  %v3707_v8 = vld [vmem:[#allocation15 + $0x1c0] sm:$0xf] }
 0x2b2   : > { %4388 = vrcp.f32 %v1362_v2  ;;  %v3724_v2 = vor.u32 %v4189_v63, %v3723_v61  ;;  %v4185_v9 = vld [vmem:[#allocation15 + $0x1cc] sm:$0xf0]  ;;  %v4171_v63 = vld [vmem:[#allocation15 + $0x164] sm:$0xf] }
 0x2b3   : > { %v1418_v10 = vpack.c.bf16 %v1417_v1, %v1417_v1  ;;  %1647 = vmatpush.bf16.msra.mxu0 %v3364_v49  ;;  %4390 = vrcp.f32 %v4751_v56  ;;  %v3597_v1 = vld [vmem:[#allocation15 + $0xf0] sm:$0xf0]  ;;  %v3708_v11 = vor.u32 %v4185_v9, %v3707_v8  ;;  %v3584_v49 = vor.u32 %v4151_v12, %v3581_v13  ;;  %v3659_v56 = vld [vmem:[#allocation15 + $0x160] sm:$0xf] }
 0x2b4   : > { %v3600_v3 = vor.u32 %v4155_v0, %v3597_v1  ;;  %v3661_v0 = vld [vmem:[#allocation15 + $0x170] sm:$0xf0]  ;;  %v3499_v13 = vld [vmem:[#allocation15 + $0x20] sm:$0xf] }
 0x2b5   : > { %3352 = vmatmul.msk.bf16.vlgmr.msrb.gmra.mxu3 %vm1353_vm2, %v1418_v10  ;;  %v3580_v10 = vor.u32 %v4153_v7, %v3579_v5  ;;  %v3664_v1 = vor.u32 %v4171_v63, %v3661_v0  ;;  %v4169_v5 = vld [vmem:[#allocation15 + $0x14c] sm:$0xf0]  ;;  %v3517_v7 = vld [vmem:[#allocation15 + $0x50] sm:$0xf0] }
 0x2b6   : > { %2178 = vmatpush.bf16.msrb.mxu3 %v3728_v6  ;;  %v4135_v6 = vld [vmem:[#allocation15 + $0x44] sm:$0xf]  ;;  %v3644_v8 = vor.u32 %v4169_v5, %v3643_v55  ;;  %v4148_v5 = vld [vmem:[#allocation15 + $0xac] sm:$0xf] }
 0x2b7   : > { %1648 = vmatpush.bf16.msra.mxu0 %v3356_v29  ;;  %v3696_v29 = vor.u32 %v4179_v24, %v3693_v25  ;;  %v3520_v9 = vor.u32 %v4135_v6, %v3517_v7  ;;  %v3483_v24 = vld [vmem:[#allocation15] sm:$0xf]  ;;  %v4129_v25 = vld [vmem:[#allocation15 + $0xc] sm:$0xf0]  ;;  %v3573_v6 = vld [vmem:[#allocation15 + $0xb8] sm:$0xf0] }
 0x2b8   : > { %v4389_v17 = vpop.eup %4388 }
 0x2b9   : > { %v1364_v18 = vmul.f32 %v4389_v17, %v5016_v53  ;;  %v3360_v53 = vor.u32 %v4095_v28, %v3357_v30  ;;  %v4391_v57 = vpop.eup %4390  ;;  %v4149_v17 = vld [vmem:[#allocation15 + $0xac] sm:$0xf0] }
 0x2ba   : > { %v1699_v58 = vmul.f32 256.0, %v4391_v57  ;;  %v3564_v22 = vor.u32 %v4149_v17, %v3563_v16  ;;  %vm1703_vm3 = vweird.f32 %v4391_v57  ;;  %v4165_v16 = vld [vmem:[#allocation15 + $0x12c] sm:$0xf0]  ;;  %v4131_v17 = vld [vmem:[#allocation15 + $0x24] sm:$0xf] }
 0x2bb   : > { %v1365_v19 = vpack.c.bf16 %v1364_v18, %v1364_v18  ;;  %1674 = vmatpush.bf16.msra.mxu2 %v3360_v53  ;;  %2139 = vmatpush.bf16.msrb.mxu0 %v3596_v62  ;;  %v3712_v18 = vor.u32 %v4183_v14, %v3709_v15  ;;  %v3536_v62 = vor.u32 %v4139_v59, %v3533_v60  ;;  %v4133_v14 = vld [vmem:[#allocation15 + $0x2c] sm:$0xf0]  ;;  %v3589_v60 = vld [vmem:[#allocation15 + $0xd8] sm:$0xf0] }
 0x2bc   : > { %v1700_v28 = vsub.f32 1.0, %v1699_v58  ;;  %v4173_v58 = vld [vmem:[#allocation15 + $0x16c] sm:$0xf0]  ;;  %v3500_v15 = vor.u32 %v4133_v14, %v3499_v13  ;;  %v4146_v13 = vld [vmem:[#allocation15 + $0x94] sm:$0xf0] }
 0x2bd   : > { %3351 = vmatmul.msk.bf16.vlgmr.msrb.gmra.mxu1 %vm1353_vm2, %v1365_v19  ;;  %v3691_v19 = vld [vmem:[#allocation15 + $0x1a0] sm:$0xf]  ;;  %2179 = vmatpush.bf16.msrb.mxu3 %v3712_v18  ;;  %v3660_v61 = vor.u32 %v4173_v58, %v3659_v56  ;;  %v3501_v18 = vld [vmem:[#allocation15 + $0x30] sm:$0xf0]  ;;  %v3715_v56 = vld [vmem:[#allocation15 + $0x1c8] sm:$0xf] }
 0x2be   : > { %2152 = vmatpush.bf16.msrb.mxu1 %v3724_v2  ;;  %v3692_v26 = vor.u32 %v4181_v20, %v3691_v19  ;;  %v1701_v30 = vmul.f32 %v4391_v57, %v1700_v28  ;;  %v3515_v2 = vld [vmem:[#allocation15 + $0x40] sm:$0xf]  ;;  %v3504_v20 = vor.u32 %v4131_v17, %v3501_v18  ;;  %v4161_v28 = vld [vmem:[#allocation15 + $0x10c] sm:$0xf0]  ;;  %v4152_v58 = vld [vmem:[#allocation15 + $0xcc] sm:$0xf] }
 0x2bf   : > { %2165 = vmatpush.bf16.msrb.mxu2 %v3600_v3  ;;  %2140 = vmatpush.bf16.msrb.mxu0 %v3580_v10  ;;  %v4137_v3 = vld [vmem:[#allocation15 + $0x4c] sm:$0xf0]  ;;  %v4167_v10 = vld [vmem:[#allocation15 + $0x144] sm:$0xf]  ;;  %v3592_v63 = vor.u32 %v4152_v58, %v3589_v60  ;;  %v3683_v14 = vld [vmem:[#allocation15 + $0x188] sm:$0xf] }
 0x2c0   : > { %v1702_v53 = vadd.f32 %v4391_v57, %v1701_v30  ;;  %v3516_v4 = vor.u32 %v4137_v3, %v3515_v2  ;;  %v3485_v30 = vld [vmem:[#allocation15 + $0x10] sm:$0xf0]  ;;  %v4150_v2 = vld [vmem:[#allocation15 + $0xb4] sm:$0xf0]  ;;  %v3699_v3 = vld [vmem:[#allocation15 + $0x1a8] sm:$0xf] }
 0x2c1   : > { %2180 = vmatpush.bf16.msrb.mxu3 %v3696_v29  ;;  %v4127_v29 = vld [vmem:[#allocation15 + $0x4] sm:$0xf]  ;;  %v4176_v17 = vld [vmem:[#allocation15 + $0x18c] sm:$0xf]  ;;  %v3509_v60 = vld [vmem:[#allocation15 + $0x38] sm:$0xf0] }
 0x2c2   : > { %2153 = vmatpush.bf16.msrb.mxu1 %v3708_v11  ;;  %v3645_v11 = vld [vmem:[#allocation15 + $0x150] sm:$0xf0] }
 0x2c3   : > { %2166 = vmatpush.bf16.msrb.mxu2 %v3584_v49  ;;  %2141 = vmatpush.bf16.msrb.mxu0 %v3564_v22  ;;  %v3648_v12 = vor.u32 %v4167_v10, %v3645_v11  ;;  %v3627_v49 = vld [vmem:[#allocation15 + $0x120] sm:$0xf]  ;;  %v3629_v22 = vld [vmem:[#allocation15 + $0x130] sm:$0xf0]  ;;  %v3701_v10 = vld [vmem:[#allocation15 + $0x1b8] sm:$0xf0] }
 0x2c4   : > { %v3628_v19 = vor.u32 %v4165_v16, %v3627_v49  ;;  %v3632_v23 = vor.u32 %v4163_v21, %v3629_v22  ;;  %v3555_v11 = vld [vmem:[#allocation15 + $0x88] sm:$0xf]  ;;  %v4178_v49 = vld [vmem:[#allocation15 + $0x194] sm:$0xf0]  ;;  %v3557_v16 = vld [vmem:[#allocation15 + $0x98] sm:$0xf0] }
 0x2c5   : > { %v3556_v18 = vor.u32 %v4146_v13, %v3555_v11  ;;  %v3621_v11 = vld [vmem:[#allocation15 + $0x118] sm:$0xf0] }
 0x2c6   : > { %2154 = vmatpush.bf16.msrb.mxu1 %v3692_v26  ;;  %v3611_v26 = vld [vmem:[#allocation15 + $0x100] sm:$0xf] }
 0x2c7   : > { %2167 = vmatpush.bf16.msrb.mxu2 %v3568_v27  ;;  %v3484_v27 = vor.u32 %v4129_v25, %v3483_v24  ;;  %v3539_v24 = vld [vmem:[#allocation15 + $0x68] sm:$0xf]  ;;  %v4142_v25 = vld [vmem:[#allocation15 + $0x74] sm:$0xf0] }
 0x338   : > { %v1437_v31 = vpop.f32.mrf.mxu3 }
 0x339   : > { %v1442_v32 = vpack.c.bf16 %v1437_v31, %v1437_v31  ;;  %v5033_v31 = vsel %vm1703_vm3, %v4391_v57, %v1702_v53  ;;  %v3612_v53 = vor.u32 %v4161_v28, %v3611_v26  ;;  %v3667_v26 = vld [vmem:[#allocation15 + $0x168] sm:$0xf]  ;;  %v3540_v28 = vor.u32 %v4142_v25, %v3539_v24 }
 0x33a   : > { %v1382_v33 = vpop.f32.mrf.mxu1 }
 0x33b   : > { %v1441_v34 = vpack.c.bf16 %v1382_v33, %v1382_v33  ;;  %1662 = vmatmul.bf16.vlgmr.msra.gmra.mxu1 %v1442_v32  ;;  %1688 = vmatmul.bf16.vlgmr.msra.gmra.mxu3 %v1442_v32 }
 0x33d   : > { %1649 = vmatmul.bf16.vlgmr.msra.gmra.mxu0 %v1441_v34  ;;  %1675 = vmatmul.bf16.vlgmr.msra.gmra.mxu2 %v1441_v34 }
 0x340   : > { %v1439_v35 = vpop.f32.mrf.mxu3 }
 0x342   : > { %v1384_v36 = vpop.f32.mrf.mxu1 }
 0x3b8   : > { %v1663_v37 = vpop.f32.mrf.mxu1 }
 0x3ba   : > { %v1650_v39 = vpop.f32.mrf.mxu0 }
 0x3bb   : > { %v1651_v43 = vadd.f32 %v1650_v39, %v1477_v40  ;;  %v3547_v39 = vld [vmem:[#allocation15 + $0x80] sm:$0xf]  ;;  %v4145_v40 = vld [vmem:[#allocation15 + $0x8c] sm:$0xf0] }
 0x3bd   : > { %v5027_v47 = vadd.f32 %v1663_v37, %v1651_v43  ;;  %v4177_v43 = vld [vmem:[#allocation15 + $0x18c] sm:$0xf0] }
 0x3be   : > { %v1689_v42 = vpop.f32.mrf.mxu3 }
 0x3c0   : > { %v1665_v44 = vpop.f32.mrf.mxu1  ;;  %v1676_v52 = vpop.f32.mrf.mxu2 }
 0x3c1   : > { %v1677_v45 = vadd.f32 %v1676_v52, %v1478_v41  ;;  %v3675_v41 = vld [vmem:[#allocation15 + $0x180] sm:$0xf]  ;;  %v4143_v44 = vld [vmem:[#allocation15 + $0x84] sm:$0xf]  ;;  %v3549_v52 = vld [vmem:[#allocation15 + $0x90] sm:$0xf0] }
 0x3c2   : > { %v1652_v46 = vpop.f32.mrf.mxu0 }
 0x3c3   : > { %v5029_v48 = vadd.f32 %v1689_v42, %v1677_v45  ;;  %v3548_v42 = vor.u32 %v4145_v40, %v3547_v39  ;;  %v3676_v45 = vor.u32 %v4177_v43, %v3675_v41  ;;  %v3552_v46 = vor.u32 %v4143_v44, %v3549_v52  ;;  %v4158_v39 = vld [vmem:[#allocation15 + $0xf4] sm:$0xf0]  ;;  %v3731_v40 = vld [vmem:[#allocation15 + $0x1e8] sm:$0xf]  ;;  %v4156_v44 = vld [vmem:[#allocation15 + $0xec] sm:$0xf] }
 0x3c4   : > { %v4190_v41 = vld [vmem:[#allocation15 + $0x1f4] sm:$0xf0]  ;;  %v3605_v52 = vld [vmem:[#allocation15 + $0xf8] sm:$0xf0] }
 0x3c5   : > { %v1695_v50 = vadd.f32 %v5029_v48, %v5027_v47  ;;  %2142 = vmatpush.bf16.msrb.mxu0 %v3548_v42  ;;  %2155 = vmatpush.bf16.msrb.mxu1 %v3676_v45  ;;  %v3732_v43 = vor.u32 %v4190_v41, %v3731_v40  ;;  %v4188_v45 = vld [vmem:[#allocation15 + $0x1ec] sm:$0xf]  ;;  %v4138_v41 = vld [vmem:[#allocation15 + $0x54] sm:$0xf0] }
 0x3c6   : > { %v1691_v51 = vpop.f32.mrf.mxu3  ;;  %2168 = vmatpush.bf16.msrb.mxu2 %v3552_v46  ;;  %v3608_v46 = vor.u32 %v4156_v44, %v3605_v52  ;;  %v4136_v44 = vld [vmem:[#allocation15 + $0x4c] sm:$0xf]  ;;  %v3525_v52 = vld [vmem:[#allocation15 + $0x58] sm:$0xf0] }
 0x3c7   : > { %1696 = vadd.xlane.f32.xlu2 %v1695_v50  ;;  %v3531_v51 = vld [vmem:[#allocation15 + $0x60] sm:$0xf] }
 0x3c8   : > { %v1678_v54 = vpop.f32.mrf.mxu2 }
 0x3c9   : > { %v4141_v54 = vld [vmem:[#allocation15 + $0x6c] sm:$0xf0]  ;;  %2156 = vmatpush.bf16.msrb.mxu1 %v3660_v61  ;;  %v4184_v61 = vld [vmem:[#allocation15 + $0x1cc] sm:$0xf] }
 0x3ca   : > { %v3532_v57 = vor.u32 %v4141_v54, %v3531_v51  ;;  %2169 = vmatpush.bf16.msrb.mxu2 %v3536_v62  ;;  %v3717_v62 = vld [vmem:[#allocation15 + $0x1d8] sm:$0xf0] }
 0x3cb   : > { %v3720_v0 = vor.u32 %v4184_v61, %v3717_v62  ;;  %v4164_v61 = vld [vmem:[#allocation15 + $0x12c] sm:$0xf]  ;;  %v3637_v62 = vld [vmem:[#allocation15 + $0x138] sm:$0xf0] }
 0x3cc   : > { %2143 = vmatpush.bf16.msrb.mxu0 %v3532_v57  ;;  %v4186_v57 = vld [vmem:[#allocation15 + $0x1d4] sm:$0xf0] }
 0x3cd   : > { %2157 = vmatpush.bf16.msrb.mxu1 %v3644_v8  ;;  %v3716_v59 = vor.u32 %v4186_v57, %v3715_v56  ;;  %v3576_v8 = vor.u32 %v4148_v5, %v3573_v6  ;;  %v3635_v56 = vld [vmem:[#allocation15 + $0x128] sm:$0xf]  ;;  %v4166_v57 = vld [vmem:[#allocation15 + $0x134] sm:$0xf0]  ;;  %v3640_v6 = vor.u32 %v4164_v61, %v3637_v62  ;;  %v3779_v62 = vld [vmem:[#allocation16 + $0x50] sm:$0xf] }
 0x3ce   : > { %2170 = vmatpush.bf16.msrb.mxu2 %v3520_v9  ;;  %v4180_v9 = vld [vmem:[#allocation15 + $0x1ac] sm:$0xf] }
 0x3d0   : > { %2144 = vmatpush.bf16.msrb.mxu0 %v3516_v4  ;;  %v4182_v4 = vld [vmem:[#allocation15 + $0x1b4] sm:$0xf0] }
 0x3d1   : > { %2158 = vmatpush.bf16.msrb.mxu1 %v3628_v19  ;;  %v3700_v7 = vor.u32 %v4182_v4, %v3699_v3  ;;  %v3684_v19 = vor.u32 %v4178_v49, %v3683_v14  ;;  %v4130_v3 = vld [vmem:[#allocation15 + $0x14] sm:$0xf0] }
 0x3d2   : > { %2171 = vmatpush.bf16.msrb.mxu2 %v3504_v20  ;;  %v3685_v20 = vld [vmem:[#allocation15 + $0x198] sm:$0xf0]  ;;  %v4162_v4 = vld [vmem:[#allocation15 + $0x114] sm:$0xf0] }
 0x3d3   : > { %v3688_v22 = vor.u32 %v4176_v17, %v3685_v20  ;;  %v1693_v17 = vld [vmem:[#allocation12] sm:$0x3]  ;;  %v1694_v20 = vld [vmem:[#allocation13] sm:$0x3] }
 0x3d4   : > { %2145 = vmatpush.bf16.msrb.mxu0 %v3500_v15  ;;  %v4144_v15 = vld [vmem:[#allocation15 + $0x8c] sm:$0xf] }
 0x3d5   : > { %2159 = vmatpush.bf16.msrb.mxu1 %v3612_v53  ;;  %v3560_v21 = vor.u32 %v4144_v15, %v3557_v16  ;;  %v3541_v53 = vld [vmem:[#allocation15 + $0x78] sm:$0xf0] }
 0x3d8   : > { %2146 = vmatpush.bf16.msrb.mxu0 %v3484_v27 }
 0x3d9   : > { %2204 = vmatpush.bf16.msra.mxu1 %v3732_v43  ;;  %v4170_v43 = vld [vmem:[#allocation15 + $0x154] sm:$0xf0] }
 0x3dd   : > { %2205 = vmatpush.bf16.msra.mxu1 %v3716_v59  ;;  %v4132_v59 = vld [vmem:[#allocation15 + $0x2c] sm:$0xf] }
 0x3e1   : > { %2206 = vmatpush.bf16.msra.mxu1 %v3700_v7  ;;  %v4128_v7 = vld [vmem:[#allocation15 + $0xc] sm:$0xf] }
 0x3e5   : > { %2207 = vmatpush.bf16.msra.mxu1 %v3684_v19 }
 0x43a   : > { %v1697_v32 = vpop.xlane.xlu2 %1696 }
 0x43b   : > { %v1705_v33 = vmul.f32 %v5033_v31, %v1697_v32  ;;  %v3488_v32 = vor.u32 %v4127_v29, %v3485_v30  ;;  %v4174_v29 = vld [vmem:[#allocation15 + $0x174] sm:$0xf0]  ;;  %v4140_v30 = vld [vmem:[#allocation15 + $0x6c] sm:$0xf] }
 0x43d   : > { %v5037_v34 = vsub.f32 %v5027_v47, %v1705_v33  ;;  %v5040_v35 = vsub.f32 %v5029_v48, %v1705_v33  ;;  %v4175_v47 = vld [vmem:[#allocation15 + $0x184] sm:$0xf]  ;;  %v3677_v48 = vld [vmem:[#allocation15 + $0x190] sm:$0xf0]  ;;  %2172 = vmatpush.bf16.msrb.mxu2 %v3488_v32  ;;  %v3668_v32 = vor.u32 %v4174_v29, %v3667_v26  ;;  %v1735_v26 = vperm.slane %v1694_v20, 0 }
 0x43e   : > { %v3680_v50 = vor.u32 %v4175_v47, %v3677_v48  ;;  %v4159_v33 = vld [vmem:[#allocation15 + $0x104] sm:$0xf]  ;;  %v3733_v47 = vld [vmem:[#allocation15 + $0x1f8] sm:$0xf0]  ;;  %v3587_v48 = vld [vmem:[#allocation15 + $0xc8] sm:$0xf] }
 0x43f   : > { %v1708_v36 = vmul.f32 %v5037_v34, %v5037_v34  ;;  %v1709_v37 = vmul.f32 %v5040_v35, %v5040_v35  ;;  %v3736_v51 = vor.u32 %v4188_v45, %v3733_v47  ;;  %2208 = vmatpush.bf16.msra.mxu1 %v3668_v32  ;;  %v4168_v47 = vld [vmem:[#allocation15 + $0x14c] sm:$0xf]  ;;  %v3795_v32 = vld [vmem:[#allocation16 + $0x70] sm:$0xf] }
 0x440   : > { %2181 = vmatpush.bf16.msrb.mxu3 %v3680_v50  ;;  %v4154_v50 = vld [vmem:[#allocation15 + $0xd4] sm:$0xf0] }
 0x441   : > { %v1710_v38 = vadd.f32 %v1709_v37, %v1708_v36  ;;  %v3613_v36 = vld [vmem:[#allocation15 + $0x110] sm:$0xf0]  ;;  %v3603_v37 = vld [vmem:[#allocation15 + $0xe8] sm:$0xf]  ;;  %v3588_v54 = vor.u32 %v4154_v50, %v3587_v48  ;;  %2217 = vmatpush.bf16.msra.mxu2 %v3608_v46  ;;  %v3653_v48 = vld [vmem:[#allocation15 + $0x158] sm:$0xf0] }
 0x442   : > { %v3604_v42 = vor.u32 %v4158_v39, %v3603_v37  ;;  %v3669_v37 = vld [vmem:[#allocation15 + $0x178] sm:$0xf0]  ;;  %v3507_v50 = vld [vmem:[#allocation15 + $0x28] sm:$0xf]  ;;  %v3656_v58 = vor.u32 %v4168_v47, %v3653_v48 }
 0x443   : > { %1711 = vadd.xlane.f32.xlu2 %v1710_v38  ;;  %v3616_v38 = vor.u32 %v4159_v33, %v3613_v36  ;;  %v3544_v33 = vor.u32 %v4140_v30, %v3541_v53  ;;  %v4172_v36 = vld [vmem:[#allocation15 + $0x16c] sm:$0xf]  ;;  %v4204_v47 = vld [vmem:[#allocation16 + $0x64] sm:$0xf0] }
 0x444   : > { %2182 = vmatpush.bf16.msrb.mxu3 %v3664_v1  ;;  %2191 = vmatpush.bf16.msra.mxu0 %v3604_v42  ;;  %v3571_v1 = vld [vmem:[#allocation15 + $0xa8] sm:$0xf]  ;;  %v3672_v40 = vor.u32 %v4172_v36, %v3669_v37  ;;  %v3859_v36 = vld [vmem:[#allocation16 + $0xf0] sm:$0xf]  ;;  %v4222_v37 = vld [vmem:[#allocation16 + $0xf4] sm:$0xf0] }
 0x445   : > { %v3572_v55 = vor.u32 %v4150_v2, %v3571_v1  ;;  %2218 = vmatpush.bf16.msra.mxu2 %v3592_v63  ;;  %v3651_v42 = vld [vmem:[#allocation15 + $0x148] sm:$0xf]  ;;  %v3512_v2 = vor.u32 %v4132_v59, %v3509_v60  ;;  %v3860_v48 = vor.u32 %v4222_v37, %v3859_v36  ;;  %v3979_v59 = vld [vmem:[#allocation16 + $0x1e0] sm:$0xf] }
 0x446   : > { %v3652_v46 = vor.u32 %v4170_v43, %v3651_v42  ;;  %v3491_v1 = vld [vmem:[#allocation15 + $0x8] sm:$0xf]  ;;  %v3987_v43 = vld [vmem:[#allocation16 + $0x1f0] sm:$0xf] }
 0x447   : > { %v4252_v60 = vld [vmem:[#allocation16 + $0x1e4] sm:$0xf0] }
 0x448   : > { %2183 = vmatpush.bf16.msrb.mxu3 %v3648_v12  ;;  %2192 = vmatpush.bf16.msra.mxu0 %v3588_v54  ;;  %v3704_v12 = vor.u32 %v4180_v9, %v3701_v10  ;;  %v4134_v54 = vld [vmem:[#allocation15 + $0x34] sm:$0xf0]  ;;  %v4160_v10 = vld [vmem:[#allocation15 + $0x10c] sm:$0xf]  ;;  %v4212_v36 = vld [vmem:[#allocation16 + $0xa4] sm:$0xf0] }
 0x449   : > { %2219 = vmatpush.bf16.msra.mxu2 %v3576_v8  ;;  %2209 = vmatpush.bf16.msra.mxu1 %v3652_v46  ;;  %v3508_v63 = vor.u32 %v4134_v54, %v3507_v50  ;;  %v3493_v8 = vld [vmem:[#allocation15 + $0x18] sm:$0xf0]  ;;  %v3624_v15 = vor.u32 %v4160_v10, %v3621_v11  ;;  %v3787_v46 = vld [vmem:[#allocation16 + $0x60] sm:$0xf]  ;;  %v4200_v10 = vld [vmem:[#allocation16 + $0x44] sm:$0xf0] }
 0x44a   : > { %v3496_v49 = vor.u32 %v4128_v7, %v3493_v8  ;;  %v3851_v50 = vld [vmem:[#allocation16 + $0xe0] sm:$0xf]  ;;  %v3788_v61 = vor.u32 %v4204_v47, %v3787_v46  ;;  %v4250_v7 = vld [vmem:[#allocation16 + $0x1d4] sm:$0xf0] }
 0x44b   : > { %v3739_v46 = vld [vmem:[#allocation16] sm:$0xf] }
 0x44c   : > { %2184 = vmatpush.bf16.msrb.mxu3 %v3632_v23  ;;  %2193 = vmatpush.bf16.msra.mxu0 %v3572_v55  ;;  %v3619_v55 = vld [vmem:[#allocation15 + $0x108] sm:$0xf] }
 0x44d   : > { %2220 = vmatpush.bf16.msra.mxu2 %v3560_v21  ;;  %v3620_v13 = vor.u32 %v4162_v4, %v3619_v55  ;;  %v1728_v21 = vperm.slane %v1693_v17, 0  ;;  %v3907_v55 = vld [vmem:[#allocation16 + $0x150] sm:$0xf]  ;;  %v3980_v4 = vor.u32 %v4252_v60, %v3979_v59  ;;  %v3789_v59 = vld [vmem:[#allocation16 + $0x68] sm:$0xf0] }
 0x450   : > { %2185 = vmatpush.bf16.msrb.mxu3 %v3616_v38  ;;  %2194 = vmatpush.bf16.msra.mxu0 %v3556_v18  ;;  %v3523_v38 = vld [vmem:[#allocation15 + $0x48] sm:$0xf] }
 0x451   : > { %v3524_v45 = vor.u32 %v4138_v41, %v3523_v38  ;;  %2221 = vmatpush.bf16.msra.mxu2 %v3544_v33  ;;  %v4206_v33 = vld [vmem:[#allocation16 + $0x74] sm:$0xf0]  ;;  %v3923_v38 = vld [vmem:[#allocation16 + $0x170] sm:$0xf] }
 0x452   : > { %v4397_v41 = vld [vmem:[%s4969_s3 + $0x8] sm:$0xff] }
 0x454   : > { %2230 = vmatpush.bf16.msra.mxu3 %v3736_v51  ;;  %2195 = vmatpush.bf16.msra.mxu0 %v3540_v28  ;;  %v3528_v51 = vor.u32 %v4136_v44, %v3525_v52 }
 0x456   : > { %2222 = vmatpush.bf16.msra.mxu2 %v3528_v51  ;;  %v4220_v51 = vld [vmem:[#allocation16 + $0xe4] sm:$0xf0] }
 0x458   : > { %2231 = vmatpush.bf16.msra.mxu3 %v3720_v0  ;;  %2196 = vmatpush.bf16.msra.mxu0 %v3524_v45  ;;  %v3636_v0 = vor.u32 %v4166_v57, %v3635_v56  ;;  %v3796_v45 = vor.u32 %v4206_v33, %v3795_v32  ;;  %v3915_v56 = vld [vmem:[#allocation16 + $0x160] sm:$0xf]  ;;  %v4196_v32 = vld [vmem:[#allocation16 + $0x24] sm:$0xf0] }
 0x459   : > { %v3819_v33 = vld [vmem:[#allocation16 + $0xa0] sm:$0xf] }
 0x45a   : > { %2210 = vmatpush.bf16.msra.mxu1 %v3636_v0  ;;  %2223 = vmatpush.bf16.msra.mxu2 %v3512_v2  ;;  %v3852_v0 = vor.u32 %v4220_v51, %v3851_v50  ;;  %v4218_v2 = vld [vmem:[#allocation16 + $0xd4] sm:$0xf0]  ;;  %v3803_v50 = vld [vmem:[#allocation16 + $0x80] sm:$0xf]  ;;  %v4208_v51 = vld [vmem:[#allocation16 + $0x84] sm:$0xf0] }
 0x45c   : > { %2232 = vmatpush.bf16.msra.mxu3 %v3704_v12  ;;  %2197 = vmatpush.bf16.msra.mxu0 %v3508_v63  ;;  %v3492_v12 = vor.u32 %v4130_v3, %v3491_v1  ;;  %v4202_v63 = vld [vmem:[#allocation16 + $0x54] sm:$0xf0]  ;;  %v3843_v1 = vld [vmem:[#allocation16 + $0xd0] sm:$0xf] }
 0x45d   : > { %v3780_v8 = vor.u32 %v4202_v63, %v3779_v62  ;;  %v3844_v11 = vor.u32 %v4218_v2, %v3843_v1  ;;  %v3861_v62 = vld [vmem:[#allocation16 + $0xf8] sm:$0xf0]  ;;  %v4228_v1 = vld [vmem:[#allocation16 + $0x124] sm:$0xf0] }
 0x45e   : > { %2211 = vmatpush.bf16.msra.mxu1 %v3620_v13  ;;  %2224 = vmatpush.bf16.msra.mxu2 %v3496_v49  ;;  %v4216_v13 = vld [vmem:[#allocation16 + $0xc4] sm:$0xf0]  ;;  %v3899_v49 = vld [vmem:[#allocation16 + $0x140] sm:$0xf] }
 0x460   : > { %2233 = vmatpush.bf16.msra.mxu3 %v3688_v22  ;;  %2198 = vmatpush.bf16.msra.mxu0 %v3492_v12  ;;  %v1729_v22 = vperm.slane %v1693_v17, 1  ;;  %v3835_v12 = vld [vmem:[#allocation16 + $0xc0] sm:$0xf] }
 0x461   : > { %v3963_v17 = vld [vmem:[#allocation16 + $0x1c0] sm:$0xf] }
 0x464   : > { %2234 = vmatpush.bf16.msra.mxu3 %v3672_v40 }
 0x468   : > { %2235 = vmatpush.bf16.msra.mxu3 %v3656_v58  ;;  %v4236_v58 = vld [vmem:[#allocation16 + $0x164] sm:$0xf0] }
 0x469   : > { %v3916_v3 = vor.u32 %v4236_v58, %v3915_v56  ;;  %v3804_v56 = vor.u32 %v4208_v51, %v3803_v50  ;;  %v4203_v58 = vld [vmem:[#allocation16 + $0x64] sm:$0xf]  ;;  %v4213_v50 = vld [vmem:[#allocation16 + $0xb4] sm:$0xf]  ;;  %v3829_v51 = vld [vmem:[#allocation16 + $0xb8] sm:$0xf0] }
 0x46a   : > { %v3792_v60 = vor.u32 %v4203_v58, %v3789_v59  ;;  %v3749_v58 = vld [vmem:[#allocation16 + $0x18] sm:$0xf0] }
 0x46c   : > { %2236 = vmatpush.bf16.msra.mxu3 %v3640_v6  ;;  %v3971_v6 = vld [vmem:[#allocation16 + $0x1d0] sm:$0xf] }
 0x470   : > { %2237 = vmatpush.bf16.msra.mxu3 %v3624_v15  ;;  %v3972_v15 = vor.u32 %v4250_v7, %v3971_v6  ;;  %v4246_v6 = vld [vmem:[#allocation16 + $0x1b4] sm:$0xf0] }
 0x4b6   : > { %v1712_v23 = vpop.xlane.xlu2 %1711 }
 0x4b7   : > { %v1713_v27 = vmul.f32 %v1712_v23, %v5033_v31 }
 0x4b9   : > { %v5047_v39 = vadd.f32 1e-05, %v1713_v27  ;;  %v1736_v27 = vperm.slane %v1694_v20, 1  ;;  %v3763_v20 = vld [vmem:[#allocation16 + $0x30] sm:$0xf] }
 0x4bb   : > { %4392 = vrsqrt.f32 %v5047_v39  ;;  %vm1721_vm5 = vweird.f32 %v5047_v39 }
 0x4c1   : > { %v4393_v5 = vpop.eup %4392 }
 0x4c2   : > { %v1716_v9 = vmul.f32 %v4393_v5, %v5047_v39  ;;  %vm1722_vm4 = vweird.f32 %v4393_v5  ;;  %v4396_v39 = vld [vmem:[%s4969_s3] sm:$0xff]  ;;  %s5167_s3 = sld [smem:[#allocation31_spill]] }
 0x4c3   : > { %vm1723_vm6 = vmor %vm1721_vm5, %vm1722_vm4 }
 0x4c4   : > { %v1717_v14 = vmul.f32 %v4393_v5, %v1716_v9  ;;  %v3771_v9 = vld [vmem:[#allocation16 + $0x40] sm:$0xf] }
 0x4c6   : > { %v1718_v16 = vmul.f32 0.5, %v1717_v14 }
 0x4c8   : > { %v1719_v18 = vsub.f32 1.5, %v1718_v16  ;;  %v4232_v16 = vld [vmem:[#allocation16 + $0x144] sm:$0xf0] }
 0x4ca   : > { %v1720_v19 = vmul.f32 %v4393_v5, %v1719_v18  ;;  %v4248_v18 = vld [vmem:[#allocation16 + $0x1c4] sm:$0xf0] }
 0x4cc   : > { %v1724_v23 = vsel %vm1723_vm6, %v4393_v5, %v1720_v19  ;;  %v4234_v5 = vld [vmem:[#allocation16 + $0x154] sm:$0xf0]  ;;  %v3772_v19 = vor.u32 %v4200_v10, %v3771_v9  ;;  %v3853_v9 = vld [vmem:[#allocation16 + $0xe8] sm:$0xf0] }
 0x4cd   : > { %v1725_v24 = vmul.f32 %v1724_v23, %v5037_v34  ;;  %v1726_v25 = vmul.f32 %v1724_v23, %v5040_v35  ;;  %v4238_v34 = vld [vmem:[#allocation16 + $0x174] sm:$0xf0]  ;;  %v3908_v14 = vor.u32 %v4234_v5, %v3907_v55  ;;  %v3827_v23 = vld [vmem:[#allocation16 + $0xb0] sm:$0xf]  ;;  %v3781_v55 = vld [vmem:[#allocation16 + $0x58] sm:$0xf0] }
 0x4ce   : > { %v4254_v35 = vld [vmem:[#allocation16 + $0x1f4] sm:$0xf0]  ;;  %v3924_v54 = vor.u32 %v4238_v34, %v3923_v38  ;;  %v3955_v5 = vld [vmem:[#allocation16 + $0x1b0] sm:$0xf] }
 0x4cf   : > { %v1732_v28 = vmul.f32 %v1728_v21, %v1725_v24  ;;  %v1733_v29 = vmul.f32 %v1729_v22, %v1726_v25  ;;  %v3988_v57 = vor.u32 %v4254_v35, %v3987_v43  ;;  %v3836_v21 = vor.u32 %v4216_v13, %v3835_v12  ;;  %v4198_v22 = vld [vmem:[#allocation16 + $0x34] sm:$0xf0]  ;;  %v3811_v43 = vld [vmem:[#allocation16 + $0x90] sm:$0xf] }
 0x4d0   : > { %v4214_v24 = vld [vmem:[#allocation16 + $0xb4] sm:$0xf0]  ;;  %v3900_v25 = vor.u32 %v4232_v16, %v3899_v49  ;;  %v3956_v7 = vor.u32 %v4246_v6, %v3955_v5  ;;  %v3773_v49 = vld [vmem:[#allocation16 + $0x48] sm:$0xf0]  ;;  %v3947_v16 = vld [vmem:[#allocation16 + $0x1a0] sm:$0xf] }
 0x4d1   : > { %v1739_v30 = vadd.f32 %v1735_v26, %v1732_v28  ;;  %v1740_v53 = vadd.f32 %v1736_v27, %v1733_v29  ;;  %v3964_v26 = vor.u32 %v4248_v18, %v3963_v17  ;;  %v3891_v27 = vld [vmem:[#allocation16 + $0x130] sm:$0xf]  ;;  %v4230_v28 = vld [vmem:[#allocation16 + $0x134] sm:$0xf0]  ;;  %v3764_v29 = vor.u32 %v4198_v22, %v3763_v20  ;;  %v4244_v17 = vld [vmem:[#allocation16 + $0x1a4] sm:$0xf0] }
 0x4d2   : > { %v3892_v37 = vor.u32 %v4230_v28, %v3891_v27  ;;  %v4194_v34 = vld [vmem:[#allocation16 + $0x14] sm:$0xf0]  ;;  %v3948_v18 = vor.u32 %v4244_v17, %v3947_v16  ;;  %v3845_v20 = vld [vmem:[#allocation16 + $0xd8] sm:$0xf0]  ;;  %v3867_v22 = vld [vmem:[#allocation16 + $0x100] sm:$0xf] }
 0x4d3   : > { %v5055_v40 = vadd.f32 %v4396_v39, %v1739_v30  ;;  %v5058_v42 = vadd.f32 %v4397_v41, %v1740_v53  ;;  %v3755_v30 = vld [vmem:[#allocation16 + $0x20] sm:$0xf]  ;;  %v3828_v53 = vor.u32 %v4214_v24, %v3827_v23  ;;  %v3747_v39 = vld [vmem:[#allocation16 + $0x10] sm:$0xf]  ;;  %v3820_v41 = vor.u32 %v4212_v36, %v3819_v33  ;;  %v4210_v35 = vld [vmem:[#allocation16 + $0x94] sm:$0xf0] }
 0x4d4   : > { %v3756_v38 = vor.u32 %v4196_v32, %v3755_v30  ;;  %v3812_v47 = vor.u32 %v4210_v35, %v3811_v43  ;;  %v4226_v12 = vld [vmem:[#allocation16 + $0x114] sm:$0xf0]  ;;  %v4224_v23 = vld [vmem:[#allocation16 + $0x104] sm:$0xf0]  ;;  %v4237_v27 = vld [vmem:[#allocation16 + $0x174] sm:$0xf] }
 0x4d5   : > { %v5062_v44 = vpack.c.bf16 %v5055_v40, %v5055_v40  ;;  %v5066_v52 = vpack.c.bf16 %v5058_v42, %v5058_v42  ;;  %v3868_v24 = vor.u32 %v4224_v23, %v3867_v22  ;;  %v3939_v30 = vld [vmem:[#allocation16 + $0x190] sm:$0xf]  ;;  %v4215_v36 = vld [vmem:[#allocation16 + $0xc4] sm:$0xf]  ;;  %v3917_v35 = vld [vmem:[#allocation16 + $0x168] sm:$0xf0] }
 0x4d6   : > { %v3741_v5 = vld [vmem:[#allocation16 + $0x8] sm:$0xf0]  ;;  %v4231_v6 = vld [vmem:[#allocation16 + $0x144] sm:$0xf]  ;;  %v3893_v16 = vld [vmem:[#allocation16 + $0x138] sm:$0xf0] }
 0x4d7   : > { %2147 = vmatmul.bf16.vlgmr.msrb.gmra.mxu0 %v5062_v44  ;;  %2160 = vmatmul.bf16.vlgmr.msrb.gmra.mxu1 %v5066_v52  ;;  %v5079_v17 = vld [vmem:[%s5142_s9] sm:$0xf]  ;;  %v3965_v23 = vld [vmem:[#allocation16 + $0x1c8] sm:$0xf0] }
 0x4d8   : > { %2173 = vmatmul.bf16.vlgmr.msrb.gmra.mxu2 %v5062_v44  ;;  %2186 = vmatmul.bf16.vlgmr.msrb.gmra.mxu3 %v5066_v52 }
 0x4d9   : > { %2641 = vmatpush.bf16.msrb.mxu0 %v3796_v45  ;;  %2654 = vmatpush.bf16.msrb.mxu1 %v3860_v48  ;;  %v3748_v45 = vor.u32 %v4194_v34, %v3747_v39  ;;  %v4192_v48 = vld [vmem:[#allocation16 + $0x4] sm:$0xf0]  ;;  %v4195_v39 = vld [vmem:[#allocation16 + $0x24] sm:$0xf] }
 0x4da   : > { %2667 = vmatpush.bf16.msrb.mxu2 %v3924_v54  ;;  %2680 = vmatpush.bf16.msrb.mxu3 %v3988_v57  ;;  %v3797_v54 = vld [vmem:[#allocation16 + $0x78] sm:$0xf0]  ;;  %v4235_v34 = vld [vmem:[#allocation16 + $0x164] sm:$0xf] }
 0x4dd   : > { %2642 = vmatpush.bf16.msrb.mxu0 %v3788_v61  ;;  %2655 = vmatpush.bf16.msrb.mxu1 %v3852_v0  ;;  %v4221_v61 = vld [vmem:[#allocation16 + $0xf4] sm:$0xf]  ;;  %v3883_v0 = vld [vmem:[#allocation16 + $0x120] sm:$0xf] }
 0x4de   : > { %2668 = vmatpush.bf16.msrb.mxu2 %v3916_v3  ;;  %2681 = vmatpush.bf16.msrb.mxu3 %v3980_v4  ;;  %v3864_v63 = vor.u32 %v4221_v61, %v3861_v62  ;;  %v3884_v2 = vor.u32 %v4228_v1, %v3883_v0  ;;  %v4201_v3 = vld [vmem:[#allocation16 + $0x54] sm:$0xf]  ;;  %v3909_v61 = vld [vmem:[#allocation16 + $0x158] sm:$0xf0]  ;;  %v3821_v0 = vld [vmem:[#allocation16 + $0xa8] sm:$0xf0] }
 0x4df   : > { %v3784_v4 = vor.u32 %v4201_v3, %v3781_v55  ;;  %v4251_v1 = vld [vmem:[#allocation16 + $0x1e4] sm:$0xf]  ;;  %v3981_v3 = vld [vmem:[#allocation16 + $0x1e8] sm:$0xf0] }
 0x4e0   : > { %v3984_v55 = vor.u32 %v4251_v1, %v3981_v3 }
 0x4e1   : > { %2643 = vmatpush.bf16.msrb.mxu0 %v3780_v8  ;;  %2656 = vmatpush.bf16.msrb.mxu1 %v3844_v11  ;;  %v4219_v8 = vld [vmem:[#allocation16 + $0xe4] sm:$0xf]  ;;  %v3875_v11 = vld [vmem:[#allocation16 + $0x110] sm:$0xf] }
 0x4e2   : > { %2669 = vmatpush.bf16.msrb.mxu2 %v3908_v14  ;;  %2682 = vmatpush.bf16.msrb.mxu3 %v3972_v15  ;;  %v3856_v10 = vor.u32 %v4219_v8, %v3853_v9  ;;  %v3876_v13 = vor.u32 %v4226_v12, %v3875_v11  ;;  %v4199_v14 = vld [vmem:[#allocation16 + $0x44] sm:$0xf]  ;;  %v3901_v8 = vld [vmem:[#allocation16 + $0x148] sm:$0xf0]  ;;  %v3813_v11 = vld [vmem:[#allocation16 + $0x98] sm:$0xf0] }
 0x4e3   : > { %v3776_v15 = vor.u32 %v4199_v14, %v3773_v49  ;;  %v3904_v9 = vor.u32 %v4231_v6, %v3901_v8  ;;  %v3973_v14 = vld [vmem:[#allocation16 + $0x1d8] sm:$0xf0] }
 0x4e5   : > { %2644 = vmatpush.bf16.msrb.mxu0 %v3772_v19  ;;  %2657 = vmatpush.bf16.msrb.mxu1 %v3836_v21  ;;  %v4217_v19 = vld [vmem:[#allocation16 + $0xd4] sm:$0xf] }
 0x4e6   : > { %2670 = vmatpush.bf16.msrb.mxu2 %v3900_v25  ;;  %2683 = vmatpush.bf16.msrb.mxu3 %v3964_v26  ;;  %v3848_v21 = vor.u32 %v4217_v19, %v3845_v20  ;;  %v4197_v25 = vld [vmem:[#allocation16 + $0x34] sm:$0xf]  ;;  %v3765_v26 = vld [vmem:[#allocation16 + $0x38] sm:$0xf0]  ;;  %v4207_v19 = vld [vmem:[#allocation16 + $0x84] sm:$0xf] }
 0x4e7   : > { %2199 = vmatmul.bf16.vlgmr.msra.gmra.mxu0 %v5062_v44  ;;  %2212 = vmatmul.bf16.vlgmr.msra.gmra.mxu1 %v5066_v52  ;;  %v3768_v28 = vor.u32 %v4197_v25, %v3765_v26  ;;  %v3805_v20 = vld [vmem:[#allocation16 + $0x88] sm:$0xf0]  ;;  %v4227_v25 = vld [vmem:[#allocation16 + $0x124] sm:$0xf] }
 0x4e8   : > { %2225 = vmatmul.bf16.vlgmr.msra.gmra.mxu2 %v5062_v44  ;;  %2238 = vmatmul.bf16.vlgmr.msra.gmra.mxu3 %v5066_v52  ;;  %v4205_v44 = vld [vmem:[#allocation16 + $0x74] sm:$0xf]  ;;  %v3740_v52 = vor.u32 %v4192_v48, %v3739_v46  ;;  %v4240_v46 = vld [vmem:[#allocation16 + $0x184] sm:$0xf0]  ;;  %v3808_v22 = vor.u32 %v4207_v19, %v3805_v20  ;;  %v3885_v26 = vld [vmem:[#allocation16 + $0x128] sm:$0xf0] }
 0x4e9   : > { %2645 = vmatpush.bf16.msrb.mxu0 %v3764_v29  ;;  %2658 = vmatpush.bf16.msrb.mxu1 %v3828_v53  ;;  %v3800_v57 = vor.u32 %v4205_v44, %v3797_v54  ;;  %v3925_v29 = vld [vmem:[#allocation16 + $0x178] sm:$0xf0]  ;;  %v4242_v53 = vld [vmem:[#allocation16 + $0x194] sm:$0xf0]  ;;  %v4253_v44 = vld [vmem:[#allocation16 + $0x1f4] sm:$0xf]  ;;  %v3832_v54 = vor.u32 %v4213_v50, %v3829_v51 }
 0x4ea   : > { %2671 = vmatpush.bf16.msrb.mxu2 %v3892_v37  ;;  %2684 = vmatpush.bf16.msrb.mxu3 %v3956_v7  ;;  %v3928_v32 = vor.u32 %v4237_v27, %v3925_v29  ;;  %v3940_v33 = vor.u32 %v4242_v53, %v3939_v30  ;;  %v3837_v37 = vld [vmem:[#allocation16 + $0xc8] sm:$0xf0]  ;;  %v1811_v27 = vperm.slane %v5079_v17, 0  ;;  %v4245_v29 = vld [vmem:[#allocation16 + $0x1b4] sm:$0xf]  ;;  %v1812_v50 = vperm.slane %v5079_v17, 1 }
 0x4eb   : > { %v3957_v30 = vld [vmem:[#allocation16 + $0x1b8] sm:$0xf0] }
 0x4ec   : > { %v3960_v53 = vor.u32 %v4245_v29, %v3957_v30 }
 0x4ed   : > { %2646 = vmatpush.bf16.msrb.mxu0 %v3756_v38  ;;  %2659 = vmatpush.bf16.msrb.mxu1 %v3820_v41  ;;  %v3840_v38 = vor.u32 %v4215_v36, %v3837_v37  ;;  %v3757_v41 = vld [vmem:[#allocation16 + $0x28] sm:$0xf0]  ;;  %v4225_v36 = vld [vmem:[#allocation16 + $0x114] sm:$0xf]  ;;  %v3877_v37 = vld [vmem:[#allocation16 + $0x118] sm:$0xf0] }
 0x4ee   : > { %2672 = vmatpush.bf16.msrb.mxu2 %v3884_v2  ;;  %2685 = vmatpush.bf16.msrb.mxu3 %v3948_v18  ;;  %v3760_v43 = vor.u32 %v4195_v39, %v3757_v41  ;;  %v3880_v41 = vor.u32 %v4225_v36, %v3877_v37 }
 0x4f1   : > { %2647 = vmatpush.bf16.msrb.mxu0 %v3748_v45  ;;  %2660 = vmatpush.bf16.msrb.mxu1 %v3812_v47  ;;  %v3931_v45 = vld [vmem:[#allocation16 + $0x180] sm:$0xf]  ;;  %v3920_v47 = vor.u32 %v4235_v34, %v3917_v35  ;;  %v3949_v34 = vld [vmem:[#allocation16 + $0x1a8] sm:$0xf0] }
 0x4f2   : > { %2673 = vmatpush.bf16.msrb.mxu2 %v3876_v13  ;;  %2686 = vmatpush.bf16.msrb.mxu3 %v3940_v33  ;;  %v3932_v48 = vor.u32 %v4240_v46, %v3931_v45  ;;  %v4249_v13 = vld [vmem:[#allocation16 + $0x1d4] sm:$0xf]  ;;  %v3869_v35 = vld [vmem:[#allocation16 + $0x108] sm:$0xf0] }
 0x4f3   : > { %v3976_v49 = vor.u32 %v4249_v13, %v3973_v14 }
 0x4f5   : > { %2648 = vmatpush.bf16.msrb.mxu0 %v3740_v52  ;;  %2661 = vmatpush.bf16.msrb.mxu1 %v3804_v56  ;;  %v3989_v52 = vld [vmem:[#allocation16 + $0x1f8] sm:$0xf0] }
 0x4f6   : > { %2674 = vmatpush.bf16.msrb.mxu2 %v3868_v24  ;;  %2687 = vmatpush.bf16.msrb.mxu3 %v3932_v48  ;;  %v3992_v56 = vor.u32 %v4253_v44, %v3989_v52  ;;  %v3941_v48 = vld [vmem:[#allocation16 + $0x198] sm:$0xf0] }
 0x4f9   : > { %2693 = vmatpush.bf16.msra.mxu0 %v3800_v57  ;;  %2706 = vmatpush.bf16.msra.mxu1 %v3864_v63  ;;  %v4193_v57 = vld [vmem:[#allocation16 + $0x14] sm:$0xf]  ;;  %v4211_v63 = vld [vmem:[#allocation16 + $0xa4] sm:$0xf] }
 0x4fa   : > { %2719 = vmatpush.bf16.msra.mxu2 %v3928_v32  ;;  %v3752_v59 = vor.u32 %v4193_v57, %v3749_v58  ;;  %2732 = vmatpush.bf16.msra.mxu3 %v3992_v56  ;;  %v3824_v2 = vor.u32 %v4211_v63, %v3821_v0 }
 0x4fd   : > { %2694 = vmatpush.bf16.msra.mxu0 %v3792_v60  ;;  %2707 = vmatpush.bf16.msra.mxu1 %v3856_v10  ;;  %v4233_v60 = vld [vmem:[#allocation16 + $0x154] sm:$0xf] }
 0x4fe   : > { %2720 = vmatpush.bf16.msra.mxu2 %v3920_v47  ;;  %v3912_v62 = vor.u32 %v4233_v60, %v3909_v61  ;;  %2733 = vmatpush.bf16.msra.mxu3 %v3984_v55  ;;  %v4209_v10 = vld [vmem:[#allocation16 + $0x94] sm:$0xf]  ;;  %v4239_v61 = vld [vmem:[#allocation16 + $0x184] sm:$0xf] }
 0x4ff   : > { %v3816_v12 = vor.u32 %v4209_v10, %v3813_v11  ;;  %v4241_v47 = vld [vmem:[#allocation16 + $0x194] sm:$0xf] }
 0x501   : > { %2695 = vmatpush.bf16.msra.mxu0 %v3784_v4  ;;  %2708 = vmatpush.bf16.msra.mxu1 %v3848_v21  ;;  %v4191_v4 = vld [vmem:[#allocation16 + $0x4] sm:$0xf] }
 0x502   : > { %2721 = vmatpush.bf16.msra.mxu2 %v3912_v62  ;;  %v3744_v7 = vor.u32 %v4191_v4, %v3741_v5  ;;  %2734 = vmatpush.bf16.msra.mxu3 %v3976_v49  ;;  %v4247_v21 = vld [vmem:[#allocation16 + $0x1c4] sm:$0xf]  ;;  %v3933_v62 = vld [vmem:[#allocation16 + $0x188] sm:$0xf0] }
 0x503   : > { %v3968_v24 = vor.u32 %v4247_v21, %v3965_v23  ;;  %v3936_v0 = vor.u32 %v4239_v61, %v3933_v62 }
 0x505   : > { %2696 = vmatpush.bf16.msra.mxu0 %v3776_v15  ;;  %2709 = vmatpush.bf16.msra.mxu1 %v3840_v38  ;;  %v4229_v15 = vld [vmem:[#allocation16 + $0x134] sm:$0xf]  ;;  %v4243_v38 = vld [vmem:[#allocation16 + $0x1a4] sm:$0xf] }
 0x506   : > { %2722 = vmatpush.bf16.msra.mxu2 %v3904_v9  ;;  %v3896_v18 = vor.u32 %v4229_v15, %v3893_v16  ;;  %2735 = vmatpush.bf16.msra.mxu3 %v3968_v24  ;;  %v3952_v45 = vor.u32 %v4243_v38, %v3949_v34  ;;  %v1814_v9 = vperm.slane %v5079_v17, 3 }
 0x509   : > { %2697 = vmatpush.bf16.msra.mxu0 %v3768_v28  ;;  %2710 = vmatpush.bf16.msra.mxu1 %v3832_v54  ;;  %v3888_v28 = vor.u32 %v4227_v25, %v3885_v26  ;;  %v3944_v54 = vor.u32 %v4241_v47, %v3941_v48 }
 0x50a   : > { %2723 = vmatpush.bf16.msra.mxu2 %v3896_v18  ;;  %2736 = vmatpush.bf16.msra.mxu3 %v3960_v53 }
 0x50d   : > { %2698 = vmatpush.bf16.msra.mxu0 %v3760_v43  ;;  %2711 = vmatpush.bf16.msra.mxu1 %v3824_v2  ;;  %v4223_v43 = vld [vmem:[#allocation16 + $0x104] sm:$0xf]  ;;  %v1813_v2 = vperm.slane %v5079_v17, 2 }
 0x50e   : > { %2724 = vmatpush.bf16.msra.mxu2 %v3888_v28  ;;  %v3872_v51 = vor.u32 %v4223_v43, %v3869_v35  ;;  %2737 = vmatpush.bf16.msra.mxu3 %v3952_v45 }
 0x511   : > { %2699 = vmatpush.bf16.msra.mxu0 %v3752_v59  ;;  %2712 = vmatpush.bf16.msra.mxu1 %v3816_v12 }
 0x512   : > { %2725 = vmatpush.bf16.msra.mxu2 %v3880_v41  ;;  %2738 = vmatpush.bf16.msra.mxu3 %v3944_v54 }
 0x515   : > { %2700 = vmatpush.bf16.msra.mxu0 %v3744_v7  ;;  %2713 = vmatpush.bf16.msra.mxu1 %v3808_v22 }
 0x516   : > { %2726 = vmatpush.bf16.msra.mxu2 %v3872_v51  ;;  %2739 = vmatpush.bf16.msra.mxu3 %v3936_v0 }
 0x554   : > { %v2148_v32 = vpop.f32.mrf.mxu0  ;;  %v2161_v33 = vpop.f32.mrf.mxu1 }
 0x555   : > { %v2149_v39 = vadd.f32 %v2148_v32, %v1811_v27  ;;  %v2315_v32 = vld [vmem:[%s5144_s11] sm:$0x3] }
 0x556   : > { %v2318_v36 = vperm.slane %v2315_v32, 1 }
 0x557   : > { %v2162_v46 = vadd.f32 %v2161_v33, %v2149_v39  ;;  %v2317_v33 = vperm.slane %v2315_v32, 0 }
 0x559   : > { %v2243_v44 = vmax.f32 %v2162_v46, 0.0 }
 0x55b   : > { %v2247_v52 = vpack.c.bf16 %v2243_v44, %v2243_v44  ;;  %v2174_v56 = vpop.f32.mrf.mxu2  ;;  %v2187_v57 = vpop.f32.mrf.mxu3 }
 0x55c   : > { %v2175_v58 = vadd.f32 %v2174_v56, %v1812_v50  ;;  %v2150_v59 = vpop.f32.mrf.mxu0  ;;  %v2163_v60 = vpop.f32.mrf.mxu1 }
 0x55d   : > { %2649 = vmatmul.bf16.vlgmr.msrb.gmra.mxu0 %v2247_v52 }
 0x55e   : > { %v2188_v63 = vadd.f32 %v2187_v57, %v2175_v58 }
 0x560   : > { %v2244_v1 = vmax.f32 %v2188_v63, 0.0 }
 0x562   : > { %v2248_v3 = vpack.c.bf16 %v2244_v1, %v2244_v1 }
 0x563   : > { %v2176_v55 = vpop.f32.mrf.mxu2  ;;  %v2189_v4 = vpop.f32.mrf.mxu3 }
 0x564   : > { %2662 = vmatmul.bf16.vlgmr.msrb.gmra.mxu1 %v2248_v3  ;;  %v2200_v5 = vpop.f32.mrf.mxu0  ;;  %v2213_v6 = vpop.f32.mrf.mxu1  ;;  %v2745_v55 = vld [vmem:[%s5166_s21] sm:$0x3]  ;;  %s4666_s21 = scalar_lea.hbm %s4665_s15, 16 }
 0x565   : > { %v2201_v7 = vadd.f32 %v2200_v5, %v1813_v2  ;;  %v2746_v5 = vld [vmem:[%s5167_s3] sm:$0x3]  ;;  %p4667_p1 = scmp.ne.s32.totalorder %s4665_s15, %s4666_s21  ;;  %p4672_p8 = scmp.lt.s32.totalorder %s4670_s26, %s4666_s21 }
 0x567   : > { %v2214_v8 = vadd.f32 %v2213_v6, %v2201_v7  ;;  %v2774_v7 = vperm.slane %v2745_v55, 1  ;;  %p4668_p3 = pnand %p4667_p1, %p4932_p13  ;;  %p4673_p7 = por %p4672_p8, %p4671_p12 }
 0x569   : > { %v2245_v10 = vmax.f32 %v2214_v8, 0.0  ;;  %p4669_p5 = pneg %p4668_p3 }
 0x56b   : > { %v2249_v11 = vpack.c.bf16 %v2245_v10, %v2245_v10  ;;  %v2226_v12 = vpop.f32.mrf.mxu2  ;;  %v2239_v13 = vpop.f32.mrf.mxu3  ;;  %v2781_v10 = vperm.slane %v2746_v5, 1  ;;  %p4674_p9 = pnand %p4673_p7, %p4669_p5 }
 0x56c   : > { %v2227_v14 = vadd.f32 %v2226_v12, %v1814_v9  ;;  %v2202_v49 = vpop.f32.mrf.mxu0  ;;  %v2215_v15 = vpop.f32.mrf.mxu1  ;;  %v2780_v9 = vperm.slane %v2746_v5, 0 }
 0x56d   : > { %2675 = vmatmul.bf16.vlgmr.msrb.gmra.mxu2 %v2249_v11  ;;  %2701 = vmatmul.bf16.vlgmr.msra.gmra.mxu0 %v2247_v52 }
 0x56e   : > { %v2240_v16 = vadd.f32 %v2239_v13, %v2227_v14 }
 0x570   : > { %v2246_v18 = vmax.f32 %v2240_v16, 0.0 }
 0x572   : > { %v2250_v19 = vpack.c.bf16 %v2246_v18, %v2246_v18 }
 0x573   : > { %v2228_v20 = vpop.f32.mrf.mxu2  ;;  %v2241_v21 = vpop.f32.mrf.mxu3 }
 0x574   : > { %2688 = vmatmul.bf16.vlgmr.msrb.gmra.mxu3 %v2250_v19  ;;  %2714 = vmatmul.bf16.vlgmr.msra.gmra.mxu1 %v2248_v3 }
 0x57d   : > { %2727 = vmatmul.bf16.vlgmr.msra.gmra.mxu2 %v2249_v11 }
 0x584   : > { %2740 = vmatmul.bf16.vlgmr.msra.gmra.mxu3 %v2250_v19 }
 0x5da   : > { %v2650_v22 = vpop.f32.mrf.mxu0 }
 0x5db   : > { %v2651_v39 = vadd.f32 %v2650_v22, %v2317_v33 }
 0x5e1   : > { %v2663_v17 = vpop.f32.mrf.mxu1 }
 0x5e2   : > { %v2652_v23 = vpop.f32.mrf.mxu0  ;;  %v2664_v34 = vadd.f32 %v2663_v17, %v2651_v39 }
 0x5e9   : > { %v2665_v24 = vpop.f32.mrf.mxu1 }
 0x5ea   : > { %v2702_v25 = vpop.f32.mrf.mxu0 }
 0x5eb   : > { %v2703_v41 = vadd.f32 %v2702_v25, %v2318_v36 }
 0x5f0   : > { %v2676_v26 = vpop.f32.mrf.mxu2 }
 0x5f1   : > { %v2715_v27 = vpop.f32.mrf.mxu1  ;;  %v2677_v35 = vadd.f32 %v2676_v26, %v2664_v34 }
 0x5f2   : > { %v2704_v28 = vpop.f32.mrf.mxu0  ;;  %v2716_v43 = vadd.f32 %v2715_v27, %v2703_v41 }
 0x5f7   : > { %v2689_v29 = vpop.f32.mrf.mxu3 }
 0x5f8   : > { %v2678_v30 = vpop.f32.mrf.mxu2  ;;  %v2690_v47 = vadd.f32 %v2689_v29, %v2677_v35 }
 0x5f9   : > { %v2717_v53 = vpop.f32.mrf.mxu1 }
 0x5ff   : > { %v2691_v37 = vpop.f32.mrf.mxu3 }
 0x600   : > { %v2728_v38 = vpop.f32.mrf.mxu2 }
 0x601   : > { %v2729_v45 = vadd.f32 %v2728_v38, %v2716_v43 }
 0x607   : > { %v2741_v46 = vpop.f32.mrf.mxu3 }
 0x608   : > { %v2742_v48 = vadd.f32 %v2741_v46, %v2729_v45  ;;  %v2730_v50 = vpop.f32.mrf.mxu2 }
 0x60a   : > { %v2747_v51 = vadd.f32 %v2742_v48, %v2690_v47 }
 0x60c   : > { %2748 = vadd.xlane.f32.xlu0 %v2747_v51 }
 0x60f   : > { %v2743_v44 = vpop.f32.mrf.mxu3 }
 0x67f   : > { %v2749_v54 = vpop.xlane.xlu0 %2748 }
 0x680   : > { %v2750_v52 = vmul.f32 %v2749_v54, %v5033_v31 }
 0x682   : > { %v2751_v56 = vsub.f32 %v2690_v47, %v2750_v52  ;;  %v2752_v57 = vsub.f32 %v2742_v48, %v2750_v52 }
 0x684   : > { %v2753_v58 = vmul.f32 %v2751_v56, %v2751_v56  ;;  %v2754_v59 = vmul.f32 %v2752_v57, %v2752_v57 }
 0x686   : > { %v2755_v60 = vadd.f32 %v2754_v59, %v2753_v58 }
 0x688   : > { %2756 = vadd.xlane.f32.xlu1 %v2755_v60 }
 0x6fb   : > { %v2757_v61 = vpop.xlane.xlu1 %2756 }
 0x6fc   : > { %v2758_v62 = vmul.f32 %v2757_v61, %v5033_v31  ;;  %v2773_v31 = vperm.slane %v2745_v55, 0 }
 0x6fe   : > { %v2759_v63 = vadd.f32 1e-05, %v2758_v62 }
 0x700   : > { %4394 = vrsqrt.f32 %v2759_v63  ;;  %vm2766_vm8 = vweird.f32 %v2759_v63 }
 0x706   : > { %v4395_v0 = vpop.eup %4394 }
 0x707   : > { %v2761_v1 = vmul.f32 %v4395_v0, %v2759_v63  ;;  %vm2767_vm7 = vweird.f32 %v4395_v0 }
 0x708   : > { %vm2768_vm9 = vmor %vm2766_vm8, %vm2767_vm7 }
 0x709   : > { %v2762_v2 = vmul.f32 %v4395_v0, %v2761_v1 }
 0x70b   : > { %v2763_v3 = vmul.f32 0.5, %v2762_v2 }
 0x70d   : > { %v2764_v4 = vsub.f32 1.5, %v2763_v3 }
 0x70f   : > { %v2765_v6 = vmul.f32 %v4395_v0, %v2764_v4 }
 0x711   : > { %v2769_v8 = vsel %vm2768_vm9, %v4395_v0, %v2765_v6 }
 0x712   : > { %v2770_v11 = vmul.f32 %v2769_v8, %v2751_v56  ;;  %v2771_v12 = vmul.f32 %v2769_v8, %v2752_v57 }
 0x714   : > { %v2777_v13 = vmul.f32 %v2773_v31, %v2770_v11  ;;  %v2778_v14 = vmul.f32 %v2774_v7, %v2771_v12 }
 0x716   : > { %v2784_v49 = vadd.f32 %v2780_v9, %v2777_v13  ;;  %v2785_v15 = vadd.f32 %v2781_v10, %v2778_v14 }
 0x718   : > { %v2786_v16 = vadd.f32 %v2784_v49, %v5055_v40  ;;  %v2787_v18 = vadd.f32 %v2785_v15, %v5058_v42 }
 0x71a   : > { %2788 = vst [vmem:[%s577_s16] sm:$0xff] %v2786_v16 }
 0x71b   : > { %2789 = vst [vmem:[%s577_s16 + $0x8] sm:$0xff] %v2787_v18 }
 0x71c   : > { %4677 = shalt.err (!%p4674_p9)
}
 0x71d   : > { %4286 = dma.vmem_to_hbm [thread:$0]  (%p4932_p13), %s2805_s22, 256, %s2807_s20, %s2791_s23  }
 0x71e PF: > { %s2818_s27 = sand.u32 1, %s4722_s17   ;;  %p5169_p10 = scmp.ge.s32.totalorder %s4734_s0, 2 }
 0x71f   : > { %s2819_s24 = scalar_lea.sflag [#allocation6], %s2818_s27 }
 0x720   : > { %p4315_p11 = pnand %p5169_p10, %p4937_p4 }
 0x722   : > { %p4316_p0 = pneg %p4315_p11 }
 0x724   : > { %4717 = dma.done.wait (%p4316_p0), %s2819_s24, 256  }
 0x725   : > { %4719 = vsyncadd (%p4316_p0), %s2819_s24, 4294967040  ;;  %p39_p2 = scmp.ge.s32.totalorder %s4912_s13, 4   ;;  %s5170_s17 = smov %s4726_s18 }
 0x726   : > { %s5171_s18 = smov %s4730_s19  ;;  %s5172_s19 = smov %s4924_s4 }
 0x727   : > { %s5173_s0 = smov %s4912_s13  ;;  %41 = sbr.rel (!%p39_p2) target bundleno = 21 (0x15), region = 145 }
 0x72c   :  { %2825 = vsyncpa [#allocation5], 1 }
 0x72d   :  { %2827 = vsyncpa [#allocation5 + $0x1], 1 }
 0x72e   :  { %2828 = vsyncpa [#allocation8], 1 }
 0x72f   :  { %2829 = vsyncpa [#allocation11], 1 }
 0x730   :  { %2830 = vsyncpa [#allocation14], 1 }
 0x731   :  { %2831 = vsyncpa [#allocation17], 1 }
 0x732   :  { %2832 = vsyncpa [#allocation6], 1 }
 0x733   :  { %2834 = vsyncpa [#allocation6 + $0x1], 1 }

</bundles_post_ra>
